<compile_context>
chip_gen: v7x
topology: tpu7x:2x2x1
jax: 0.10.0
libtpu: 0.0.40
codegen_flags: <defaults>
</compile_context>

<pallas_src>
import functools
import math

import jax
import jax.numpy as jnp
from jax import lax
from jax.experimental import pallas as pl
from jax.experimental.pallas import tpu as pltpu


def _round_up(x, m):
    return (x + m - 1) // m * m


def _sigmoid(x):
    # One EUP tanh push per gate instead of exp + reciprocal (two pushes).
    return 0.5 * (jnp.tanh(0.5 * x) + 1.0)


# ----------------------------------------------------------------------------
# GRU recurrence kernel (time-blocked, fused hidden-gate matmul)
# ----------------------------------------------------------------------------
def _gru_kernel(gi_ref, wh_ref, bhn_ref, o_ref, h_scr, *, tl, hp):
    """One grid step = `tl` timesteps of the GRU recurrence.

    gi_ref : (TL, Np, 3*Hp) f32 precomputed input-gate pre-activations
             [x@W_ir^T + b_ir + b_hr | x@W_iz^T + b_iz + b_hz | x@W_in^T + b_in]
    wh_ref : (Hp, 3*Hp)     fused hidden weights [W_hr^T | W_hz^T | W_hn^T]
                            (bf16 on the perf path, f32 on the exact path)
    bhn_ref: (1, Hp)  f32   b_hn (kept separate because it is gated by r)
    o_ref  : (TL, Np, Hp)   hidden state for every timestep in the block
    h_scr  : (Np, Hp) f32   hidden state carried across grid steps
    """
    @pl.when(pl.program_id(0) == 0)
    def _():
        h_scr[...] = jnp.zeros_like(h_scr)

    wh = wh_ref[...]            # grid-invariant weights, resident in VMEM
    bhn = bhn_ref[...]

    def step(s, h):
        g = gi_ref[s]                                            # (Np, 3Hp) f32
        # bf16 operands, f32 accumulation; gate math stays f32.
        gh = jnp.dot(h.astype(wh.dtype), wh,
                     preferred_element_type=jnp.float32)         # (Np, 3Hp)
        r = _sigmoid(g[:, :hp] + gh[:, :hp])
        z = _sigmoid(g[:, hp:2 * hp] + gh[:, hp:2 * hp])
        n = jnp.tanh(g[:, 2 * hp:] + r * (gh[:, 2 * hp:] + bhn))
        h = (1.0 - z) * n + z * h
        o_ref[s] = h.astype(o_ref.dtype)                         # lane-dense store
        return h

    # Moderate unroll: keeps ~10-12 live vregs per step instead of a single
    # TL-deep basic block that spills onto the serial critical path.
    h_scr[...] = lax.fori_loop(0, tl, step, h_scr[...],
                               unroll=max(1, min(8, tl)))


def gru_forward(gi, wh_all, bhn, *, tl):
    """gi: (Lp, Np, 3Hp) time-major, padded.  Returns (Lp, Np, Hp) f32."""
    lp, np_pad, three_hp = gi.shape
    hp = three_hp // 3
    assert lp % tl == 0
    kernel = functools.partial(_gru_kernel, tl=tl, hp=hp)
    return pl.pallas_call(
        kernel,
        out_shape=jax.ShapeDtypeStruct((lp, np_pad, hp), jnp.float32),
        grid_spec=pltpu.PrefetchScalarGridSpec(
            num_scalar_prefetch=0,
            grid=(lp // tl,),
            in_specs=[
                pl.BlockSpec((tl, np_pad, three_hp), lambda t: (t, 0, 0)),
                # Weights / bias are grid-invariant (constant index_map).
                pl.BlockSpec((hp, three_hp), lambda t: (0, 0)),
                pl.BlockSpec((1, hp), lambda t: (0, 0)),
            ],
            out_specs=pl.BlockSpec((tl, np_pad, hp), lambda t: (t, 0, 0)),
            scratch_shapes=[pltpu.VMEM((np_pad, hp), jnp.float32)],
        ),
        compiler_params=pltpu.CompilerParams(
            # The recurrence over time is strictly sequential.
            dimension_semantics=("arbitrary",),
            # Fits the v7x 32 MiB scoped VMEM; raise on v5e/v6e at large H/TL.
            vmem_limit_bytes=32 * 1024 * 1024,
        ),
    )(gi, wh_all, bhn)


# ----------------------------------------------------------------------------
# Parameter packing: PyTorch layout -> fused, lane-padded kernel operands
# ----------------------------------------------------------------------------
def _pack_gru_params(params, input_size, hidden, matmul_dtype):
    hp = _round_up(hidden, 128)
    w_ih, w_hh = params["w_ih"], params["w_hh"]      # (3H, C), (3H, H)
    b_ih, b_hh = params["b_ih"], params["b_hh"]      # (3H,),  (3H,)

    def pad_cols(w_t):                               # (in, H) -> (in, Hp)
        return jnp.pad(w_t, ((0, 0), (0, hp - hidden)))

    def pad_sq(w_t):                                 # (H, H) -> (Hp, Hp)
        return jnp.pad(w_t, ((0, hp - hidden), (0, hp - hidden)))

    def pad_b(b):
        return jnp.pad(b, (0, hp - hidden))

    # PyTorch gate order: [r | z | n].
    wi_all = jnp.concatenate(
        [pad_cols(w_ih[g * hidden:(g + 1) * hidden].T) for g in range(3)],
        axis=1)                                      # (C, 3Hp)
    wh_all = jnp.concatenate(
        [pad_sq(w_hh[g * hidden:(g + 1) * hidden].T) for g in range(3)],
        axis=1)                                      # (Hp, 3Hp)
    bi_all = jnp.concatenate([
        pad_b(b_ih[:hidden] + b_hh[:hidden]),                       # b_ir + b_hr
        pad_b(b_ih[hidden:2 * hidden] + b_hh[hidden:2 * hidden]),   # b_iz + b_hz
        pad_b(b_ih[2 * hidden:]),                                   # b_in
    ])                                               # (3Hp,)
    bhn = pad_b(b_hh[2 * hidden:]).reshape(1, hp)    # b_hn stays separate (r-gated)
    return {
        "wi_ts": wi_all[:input_size],                # (input_size, 3Hp) f32
        "wi_dem": wi_all[input_size:],               # (20, 3Hp) f32
        "wh_all": wh_all.astype(matmul_dtype),       # bf16 on the perf path
        "bi_all": bi_all,
        "bhn": bhn,
    }


# ----------------------------------------------------------------------------
# Full module forward
# ----------------------------------------------------------------------------
@functools.partial(jax.jit, static_argnames=("matmul_dtype",))
def patient_rnn_encoder(timesteps, dem, params, *, matmul_dtype=jnp.bfloat16):
    """timesteps: (N, L, input_size) f32, dem: (N, dem_size) f32 -> (N, L, H)."""
    n, l, input_size = timesteps.shape
    hidden = params["w_hh"].shape[1]
    hp = _round_up(hidden, 128)
    np_pad = _round_up(n, 8)
    n_blocks = -(-l // 64)                 # <= 64 timesteps per grid step
    tl = -(-l // n_blocks)
    lp = tl * n_blocks

    # dem_fc: Linear(dem,40) -> ReLU -> Dropout(0) -> Linear(40,20) -> ReLU.
    # Tiny MLP; plain XLA fuses this for free (a pallas_call is pure overhead).
    # TODO(synk): nn.Dropout(dem_dropout=0.0) is the identity at inference.
    h1 = jnp.maximum(dem @ params["fc_w1"].T + params["fc_b1"], 0.0)
    dem20 = jnp.maximum(h1 @ params["fc_w2"].T + params["fc_b2"], 0.0)

    packed = _pack_gru_params(params, input_size, hidden, matmul_dtype)

    # Pad the SMALL inputs first so the hoisted input-side gate matmul emits
    # gi directly at its padded (Lp, Np, 3Hp) shape -- no post-hoc jnp.pad of
    # the largest intermediate (which cost a full extra HBM read+write).
    ts_pad = jnp.pad(timesteps, ((0, np_pad - n), (0, lp - l), (0, 0)))
    dem20_pad = jnp.pad(dem20, ((0, np_pad - n), (0, 0)))

    # Hoisted input-side gate matmul for ALL timesteps at once, with the
    # dem20 contribution folded in as a per-sequence bias.  Replaces
    # concat([timesteps, dem20]) + broadcast and per-timestep input matmuls.
    # TODO(synk): emit gi in bf16 on v7x to halve the streaming block / DMA.
    gi = (jnp.einsum("nlc,ch->lnh", ts_pad, packed["wi_ts"])
          + (dem20_pad @ packed["wi_dem"])[None, :, :]
          + packed["bi_all"][None, None, :])                     # (Lp, Np, 3Hp)

    out = gru_forward(gi, packed["wh_all"], packed["bhn"], tl=tl)  # (Lp, Np, Hp)
    # TODO(synk): if the consumer accepts time-major (L, N, H) output, drop
    # this transpose (a full extra HBM read+write of the output).
    return jnp.transpose(out[:l, :n, :hidden], (1, 0, 2))          # (N, L, H)


# ----------------------------------------------------------------------------
# PyTorch-style parameter construction (PyTorch tensor layouts)
# ----------------------------------------------------------------------------
def init_params(key, input_size, dem_size, hidden_size):
    ks = jax.random.split(key, 8)
    u = lambda k, shape, bound: jax.random.uniform(
        k, shape, jnp.float32, minval=-bound, maxval=bound)
    c = input_size + 20                     # GRU input = timesteps ++ dem_fc(dem)
    b1 = 1.0 / math.sqrt(dem_size)
    b2 = 1.0 / math.sqrt(40.0)
    bh = 1.0 / math.sqrt(hidden_size)
    return {
        "fc_w1": u(ks[0], (40, dem_size), b1), "fc_b1": u(ks[1], (40,), b1),
        "fc_w2": u(ks[2], (20, 40), b2), "fc_b2": u(ks[3], (20,), b2),
        "w_ih": u(ks[4], (3 * hidden_size, c), bh),
        "w_hh": u(ks[5], (3 * hidden_size, hidden_size), bh),
        "b_ih": u(ks[6], (3 * hidden_size,), bh),
        "b_hh": u(ks[7], (3 * hidden_size,), bh),
    }


# ----------------------------------------------------------------------------
# Pure-JAX reference implementing the PyTorch module directly
# ----------------------------------------------------------------------------
def reference_forward(timesteps, dem, params, matmul_dtype=jnp.float32):
    n, l, _ = timesteps.shape
    h1 = jnp.maximum(dem @ params["fc_w1"].T + params["fc_b1"], 0.0)
    dem20 = jnp.maximum(h1 @ params["fc_w2"].T + params["fc_b2"], 0.0)
    x = jnp.concatenate(
        [timesteps, jnp.broadcast_to(dem20[:, None, :], (n, l, 20))], axis=-1)
    hsz = params["w_hh"].shape[1]
    w_ih, w_hh = params["w_ih"], params["w_hh"]
    b_ih, b_hh = params["b_ih"], params["b_hh"]
    w_hh_t = w_hh.T.astype(matmul_dtype)

    def cell(h, x_t):
        gi = x_t @ w_ih.T + b_ih
        gh = jnp.dot(h.astype(matmul_dtype), w_hh_t,
                     preferred_element_type=jnp.float32) + b_hh
        r = jax.nn.sigmoid(gi[:, :hsz] + gh[:, :hsz])
        z = jax.nn.sigmoid(gi[:, hsz:2 * hsz] + gh[:, hsz:2 * hsz])
        m = jnp.tanh(gi[:, 2 * hsz:] + r * gh[:, 2 * hsz:])
        h_new = (1.0 - z) * m + z * h
        return h_new, h_new

    h0 = jnp.zeros((n, hsz), jnp.float32)
    _, ys = jax.lax.scan(cell, h0, jnp.transpose(x, (1, 0, 2)))
    return jnp.transpose(ys, (1, 0, 2))


if __name__ == "__main__":
    key = jax.random.PRNGKey(0)

    # Config 1: small shapes, exact f32 path vs. f32 reference.
    n, l = 2, 8
    input_size, dem_size, hidden = 16, 10, 32
    k_ts, k_dem, k_par, key = jax.random.split(key, 4)
    timesteps = jax.random.normal(k_ts, (n, l, input_size), jnp.float32)
    dem = jax.random.normal(k_dem, (n, dem_size), jnp.float32)
    params = init_params(k_par, input_size, dem_size, hidden)

    out = jax.block_until_ready(
        patient_rnn_encoder(timesteps, dem, params, matmul_dtype=jnp.float32))
    assert out.shape == (n, l, hidden), out.shape
    ref = reference_forward(timesteps, dem, params)
    err = float(jnp.max(jnp.abs(out - ref)))
    assert err < 1e-4, err

    # Config 2: default pat_hidden_size=128, multi-block time grid,
    # non-multiple-of-8 batch (exercises padding + hidden-state carry).
    n2, l2 = 3, 100
    input_size2, hidden2 = 24, 128
    k_ts2, k_dem2, k_par2, key = jax.random.split(key, 4)
    timesteps2 = jax.random.normal(k_ts2, (n2, l2, input_size2), jnp.float32)
    dem2 = jax.random.normal(k_dem2, (n2, dem_size), jnp.float32)
    params2 = init_params(k_par2, input_size2, dem_size, hidden2)

    # 2a: exact f32 path, tight tolerance against the f32 reference.
    out2 = jax.block_until_ready(
        patient_rnn_encoder(timesteps2, dem2, params2, matmul_dtype=jnp.float32))
    assert out2.shape == (n2, l2, hidden2), out2.shape
    ref2 = reference_forward(timesteps2, dem2, params2)
    err2 = float(jnp.max(jnp.abs(out2 - ref2)))
    assert err2 < 3e-4, err2

    # 2b: default bf16-operand perf path, checked against a reference that
    # applies the same bf16 rounding to the recurrent matmul operands.
    out2_bf = jax.block_until_ready(
        patient_rnn_encoder(timesteps2, dem2, params2))       # bf16 default
    ref2_bf = reference_forward(timesteps2, dem2, params2,
                                matmul_dtype=jnp.bfloat16)
    err2_bf = float(jnp.max(jnp.abs(out2_bf - ref2_bf)))
    assert err2_bf < 1e-2, err2_bf

    print("KERNEL_OK")
</pallas_src>

<mosaic_0001>
module attributes {stable_mosaic.version = 11 : i64} {
  func.func @_gru_kernel(%arg0: i32, %arg1: memref<8x8x384xf32, #tpu.memory_space<vmem>>, %arg2: memref<128x384xf32, #tpu.memory_space<vmem>>, %arg3: memref<1x128xf32, #tpu.memory_space<vmem>>, %arg4: memref<8x8x128xf32, #tpu.memory_space<vmem>>, %arg5: memref<8x128xf32, #tpu.memory_space<vmem>>) attributes {dimension_semantics = [#tpu.dimension_semantics<arbitrary>], iteration_bounds = array<i64: 1>, scalar_prefetch = 0 : i64, scratch_operands = 1 : i64, tpu.core_type = #tpu.core_type<tc>, window_params = [{transform_indices = @transform_0, window_bounds = array<i64: 8, 8, 384>}, {pipeline_mode = #tpu.pipeline_mode<synchronous>, transform_indices = @transform_1, window_bounds = array<i64: 128, 384>}, {pipeline_mode = #tpu.pipeline_mode<synchronous>, transform_indices = @transform_2, window_bounds = array<i64: 1, 128>}, {transform_indices = @transform_3, window_bounds = array<i64: 8, 8, 128>}]} {
    %c0_i32 = arith.constant 0 : i32
    %0 = arith.cmpi eq, %arg0, %c0_i32 : i32
    %1 = arith.extui %0 : i1 to i32
    %c0_i32_0 = arith.constant 0 : i32
    %2 = arith.cmpi ne, %1, %c0_i32_0 : i32
    scf.if %2 {
      %cst_104 = arith.constant 0.000000e+00 : f32
      %327 = vector.broadcast %cst_104 : f32 to vector<8x128xf32>
      %c0_105 = arith.constant 0 : index
      %c0_106 = arith.constant 0 : index
      %328 = vector.load %arg5[%c0_105, %c0_106] : memref<8x128xf32, #tpu.memory_space<vmem>>, vector<8x128xf32>
      tpu.vector_store %arg5[%c0_105, %c0_106], %327 {strides = array<i32>} : memref<8x128xf32, #tpu.memory_space<vmem>>, vector<8x128xf32>,
    } else {
    }
    %c0 = arith.constant 0 : index
    %c0_1 = arith.constant 0 : index
    %3 = vector.load %arg2[%c0, %c0_1] : memref<128x384xf32, #tpu.memory_space<vmem>>, vector<128x384xf32>
    %c0_2 = arith.constant 0 : index
    %c0_3 = arith.constant 0 : index
    %4 = vector.load %arg3[%c0_2, %c0_3] : memref<1x128xf32, #tpu.memory_space<vmem>>, vector<1x128xf32>
    %c0_4 = arith.constant 0 : index
    %c0_5 = arith.constant 0 : index
    %5 = vector.load %arg5[%c0_4, %c0_5] : memref<8x128xf32, #tpu.memory_space<vmem>>, vector<8x128xf32>
    %c0_i32_6 = arith.constant 0 : i32
    %6 = arith.index_cast %c0_i32_6 : i32 to index
    %c0_7 = arith.constant 0 : index
    %c0_8 = arith.constant 0 : index
    %7 = vector.load %arg1[%6, %c0_7, %c0_8] : memref<8x8x384xf32, #tpu.memory_space<vmem>>, vector<1x8x384xf32>
    %8 = vector.shape_cast %7 : vector<1x8x384xf32> to vector<8x384xf32>
    %cst = arith.constant dense<0.000000e+00> : vector<8x384xf32>
    %9 = tpu.matmul %5, %3, %cst {dimension_numbers = #tpu.dot_dimension_numbers<[1], [0], [0], [1], [0, 0, 1, 1], [], []>} : vector<8x128xf32>, vector<128x384xf32>, vector<8x384xf32> -> vector<8x384xf32>
    %10 = vector.extract_strided_slice %8 {offsets = [0, 0], sizes = [8, 128], strides = [1, 1]} : vector<8x384xf32> to vector<8x128xf32>
    %11 = vector.extract_strided_slice %9 {offsets = [0, 0], sizes = [8, 128], strides = [1, 1]} : vector<8x384xf32> to vector<8x128xf32>
    %12 = arith.addf %10, %11 : vector<8x128xf32>
    %cst_9 = arith.constant 5.000000e-01 : f32
    %13 = vector.broadcast %cst_9 : f32 to vector<8x128xf32>
    %14 = arith.mulf %13, %12 : vector<8x128xf32>
    %15 = math.tanh %14 : vector<8x128xf32>
    %cst_10 = arith.constant 1.000000e+00 : f32
    %16 = vector.broadcast %cst_10 : f32 to vector<8x128xf32>
    %17 = arith.addf %15, %16 : vector<8x128xf32>
    %cst_11 = arith.constant 5.000000e-01 : f32
    %18 = vector.broadcast %cst_11 : f32 to vector<8x128xf32>
    %19 = arith.mulf %18, %17 : vector<8x128xf32>
    %20 = vector.extract_strided_slice %8 {offsets = [0, 128], sizes = [8, 128], strides = [1, 1]} : vector<8x384xf32> to vector<8x128xf32>
    %21 = vector.extract_strided_slice %9 {offsets = [0, 128], sizes = [8, 128], strides = [1, 1]} : vector<8x384xf32> to vector<8x128xf32>
    %22 = arith.addf %20, %21 : vector<8x128xf32>
    %cst_12 = arith.constant 5.000000e-01 : f32
    %23 = vector.broadcast %cst_12 : f32 to vector<8x128xf32>
    %24 = arith.mulf %23, %22 : vector<8x128xf32>
    %25 = math.tanh %24 : vector<8x128xf32>
    %cst_13 = arith.constant 1.000000e+00 : f32
    %26 = vector.broadcast %cst_13 : f32 to vector<8x128xf32>
    %27 = arith.addf %25, %26 : vector<8x128xf32>
    %cst_14 = arith.constant 5.000000e-01 : f32
    %28 = vector.broadcast %cst_14 : f32 to vector<8x128xf32>
    %29 = arith.mulf %28, %27 : vector<8x128xf32>
    %30 = vector.extract_strided_slice %8 {offsets = [0, 256], sizes = [8, 128], strides = [1, 1]} : vector<8x384xf32> to vector<8x128xf32>
    %31 = vector.extract_strided_slice %9 {offsets = [0, 256], sizes = [8, 128], strides = [1, 1]} : vector<8x384xf32> to vector<8x128xf32>
    %32 = vector.broadcast %4 : vector<1x128xf32> to vector<8x128xf32>
    %33 = arith.addf %31, %32 : vector<8x128xf32>
    %34 = arith.mulf %19, %33 : vector<8x128xf32>
    %35 = arith.addf %30, %34 : vector<8x128xf32>
    %36 = math.tanh %35 : vector<8x128xf32>
    %cst_15 = arith.constant 1.000000e+00 : f32
    %37 = vector.broadcast %cst_15 : f32 to vector<8x128xf32>
    %38 = arith.subf %37, %29 : vector<8x128xf32>
    %39 = arith.mulf %38, %36 : vector<8x128xf32>
    %40 = arith.mulf %29, %5 : vector<8x128xf32>
    %41 = arith.addf %39, %40 : vector<8x128xf32>
    %42 = arith.index_cast %c0_i32_6 : i32 to index
    %c0_16 = arith.constant 0 : index
    %c0_17 = arith.constant 0 : index
    %43 = vector.load %arg4[%42, %c0_16, %c0_17] : memref<8x8x128xf32, #tpu.memory_space<vmem>>, vector<1x8x128xf32>
    %44 = vector.shape_cast %43 : vector<1x8x128xf32> to vector<8x128xf32>
    %45 = vector.shape_cast %41 : vector<8x128xf32> to vector<1x8x128xf32>
    tpu.vector_store %arg4[%42, %c0_16, %c0_17], %45 {strides = array<i32>} : memref<8x8x128xf32, #tpu.memory_space<vmem>>, vector<1x8x128xf32>,
    %c1_i32 = arith.constant 1 : i32
    %46 = arith.index_cast %c1_i32 : i32 to index
    %c0_18 = arith.constant 0 : index
    %c0_19 = arith.constant 0 : index
    %47 = vector.load %arg1[%46, %c0_18, %c0_19] : memref<8x8x384xf32, #tpu.memory_space<vmem>>, vector<1x8x384xf32>
    %48 = vector.shape_cast %47 : vector<1x8x384xf32> to vector<8x384xf32>
    %cst_20 = arith.constant dense<0.000000e+00> : vector<8x384xf32>
    %49 = tpu.matmul %41, %3, %cst_20 {dimension_numbers = #tpu.dot_dimension_numbers<[1], [0], [0], [1], [0, 0, 1, 1], [], []>} : vector<8x128xf32>, vector<128x384xf32>, vector<8x384xf32> -> vector<8x384xf32>
    %50 = vector.extract_strided_slice %48 {offsets = [0, 0], sizes = [8, 128], strides = [1, 1]} : vector<8x384xf32> to vector<8x128xf32>
    %51 = vector.extract_strided_slice %49 {offsets = [0, 0], sizes = [8, 128], strides = [1, 1]} : vector<8x384xf32> to vector<8x128xf32>
    %52 = arith.addf %50, %51 : vector<8x128xf32>
    %cst_21 = arith.constant 5.000000e-01 : f32
    %53 = vector.broadcast %cst_21 : f32 to vector<8x128xf32>
    %54 = arith.mulf %53, %52 : vector<8x128xf32>
    %55 = math.tanh %54 : vector<8x128xf32>
    %cst_22 = arith.constant 1.000000e+00 : f32
    %56 = vector.broadcast %cst_22 : f32 to vector<8x128xf32>
    %57 = arith.addf %55, %56 : vector<8x128xf32>
    %cst_23 = arith.constant 5.000000e-01 : f32
    %58 = vector.broadcast %cst_23 : f32 to vector<8x128xf32>
    %59 = arith.mulf %58, %57 : vector<8x128xf32>
    %60 = vector.extract_strided_slice %48 {offsets = [0, 128], sizes = [8, 128], strides = [1, 1]} : vector<8x384xf32> to vector<8x128xf32>
    %61 = vector.extract_strided_slice %49 {offsets = [0, 128], sizes = [8, 128], strides = [1, 1]} : vector<8x384xf32> to vector<8x128xf32>
    %62 = arith.addf %60, %61 : vector<8x128xf32>
    %cst_24 = arith.constant 5.000000e-01 : f32
    %63 = vector.broadcast %cst_24 : f32 to vector<8x128xf32>
    %64 = arith.mulf %63, %62 : vector<8x128xf32>
    %65 = math.tanh %64 : vector<8x128xf32>
    %cst_25 = arith.constant 1.000000e+00 : f32
    %66 = vector.broadcast %cst_25 : f32 to vector<8x128xf32>
    %67 = arith.addf %65, %66 : vector<8x128xf32>
    %cst_26 = arith.constant 5.000000e-01 : f32
    %68 = vector.broadcast %cst_26 : f32 to vector<8x128xf32>
    %69 = arith.mulf %68, %67 : vector<8x128xf32>
    %70 = vector.extract_strided_slice %48 {offsets = [0, 256], sizes = [8, 128], strides = [1, 1]} : vector<8x384xf32> to vector<8x128xf32>
    %71 = vector.extract_strided_slice %49 {offsets = [0, 256], sizes = [8, 128], strides = [1, 1]} : vector<8x384xf32> to vector<8x128xf32>
    %72 = vector.broadcast %4 : vector<1x128xf32> to vector<8x128xf32>
    %73 = arith.addf %71, %72 : vector<8x128xf32>
    %74 = arith.mulf %59, %73 : vector<8x128xf32>
    %75 = arith.addf %70, %74 : vector<8x128xf32>
    %76 = math.tanh %75 : vector<8x128xf32>
    %cst_27 = arith.constant 1.000000e+00 : f32
    %77 = vector.broadcast %cst_27 : f32 to vector<8x128xf32>
    %78 = arith.subf %77, %69 : vector<8x128xf32>
    %79 = arith.mulf %78, %76 : vector<8x128xf32>
    %80 = arith.mulf %69, %41 : vector<8x128xf32>
    %81 = arith.addf %79, %80 : vector<8x128xf32>
    %82 = arith.index_cast %c1_i32 : i32 to index
    %c0_28 = arith.constant 0 : index
    %c0_29 = arith.constant 0 : index
    %83 = vector.load %arg4[%82, %c0_28, %c0_29] : memref<8x8x128xf32, #tpu.memory_space<vmem>>, vector<1x8x128xf32>
    %84 = vector.shape_cast %83 : vector<1x8x128xf32> to vector<8x128xf32>
    %85 = vector.shape_cast %81 : vector<8x128xf32> to vector<1x8x128xf32>
    tpu.vector_store %arg4[%82, %c0_28, %c0_29], %85 {strides = array<i32>} : memref<8x8x128xf32, #tpu.memory_space<vmem>>, vector<1x8x128xf32>,
    %c2_i32 = arith.constant 2 : i32
    %86 = arith.index_cast %c2_i32 : i32 to index
    %c0_30 = arith.constant 0 : index
    %c0_31 = arith.constant 0 : index
    %87 = vector.load %arg1[%86, %c0_30, %c0_31] : memref<8x8x384xf32, #tpu.memory_space<vmem>>, vector<1x8x384xf32>
    %88 = vector.shape_cast %87 : vector<1x8x384xf32> to vector<8x384xf32>
    %cst_32 = arith.constant dense<0.000000e+00> : vector<8x384xf32>
    %89 = tpu.matmul %81, %3, %cst_32 {dimension_numbers = #tpu.dot_dimension_numbers<[1], [0], [0], [1], [0, 0, 1, 1], [], []>} : vector<8x128xf32>, vector<128x384xf32>, vector<8x384xf32> -> vector<8x384xf32>
    %90 = vector.extract_strided_slice %88 {offsets = [0, 0], sizes = [8, 128], strides = [1, 1]} : vector<8x384xf32> to vector<8x128xf32>
    %91 = vector.extract_strided_slice %89 {offsets = [0, 0], sizes = [8, 128], strides = [1, 1]} : vector<8x384xf32> to vector<8x128xf32>
    %92 = arith.addf %90, %91 : vector<8x128xf32>
    %cst_33 = arith.constant 5.000000e-01 : f32
    %93 = vector.broadcast %cst_33 : f32 to vector<8x128xf32>
    %94 = arith.mulf %93, %92 : vector<8x128xf32>
    %95 = math.tanh %94 : vector<8x128xf32>
    %cst_34 = arith.constant 1.000000e+00 : f32
    %96 = vector.broadcast %cst_34 : f32 to vector<8x128xf32>
    %97 = arith.addf %95, %96 : vector<8x128xf32>
    %cst_35 = arith.constant 5.000000e-01 : f32
    %98 = vector.broadcast %cst_35 : f32 to vector<8x128xf32>
    %99 = arith.mulf %98, %97 : vector<8x128xf32>
    %100 = vector.extract_strided_slice %88 {offsets = [0, 128], sizes = [8, 128], strides = [1, 1]} : vector<8x384xf32> to vector<8x128xf32>
    %101 = vector.extract_strided_slice %89 {offsets = [0, 128], sizes = [8, 128], strides = [1, 1]} : vector<8x384xf32> to vector<8x128xf32>
    %102 = arith.addf %100, %101 : vector<8x128xf32>
    %cst_36 = arith.constant 5.000000e-01 : f32
    %103 = vector.broadcast %cst_36 : f32 to vector<8x128xf32>
    %104 = arith.mulf %103, %102 : vector<8x128xf32>
    %105 = math.tanh %104 : vector<8x128xf32>
    %cst_37 = arith.constant 1.000000e+00 : f32
    %106 = vector.broadcast %cst_37 : f32 to vector<8x128xf32>
    %107 = arith.addf %105, %106 : vector<8x128xf32>
    %cst_38 = arith.constant 5.000000e-01 : f32
    %108 = vector.broadcast %cst_38 : f32 to vector<8x128xf32>
    %109 = arith.mulf %108, %107 : vector<8x128xf32>
    %110 = vector.extract_strided_slice %88 {offsets = [0, 256], sizes = [8, 128], strides = [1, 1]} : vector<8x384xf32> to vector<8x128xf32>
    %111 = vector.extract_strided_slice %89 {offsets = [0, 256], sizes = [8, 128], strides = [1, 1]} : vector<8x384xf32> to vector<8x128xf32>
    %112 = vector.broadcast %4 : vector<1x128xf32> to vector<8x128xf32>
    %113 = arith.addf %111, %112 : vector<8x128xf32>
    %114 = arith.mulf %99, %113 : vector<8x128xf32>
    %115 = arith.addf %110, %114 : vector<8x128xf32>
    %116 = math.tanh %115 : vector<8x128xf32>
    %cst_39 = arith.constant 1.000000e+00 : f32
    %117 = vector.broadcast %cst_39 : f32 to vector<8x128xf32>
    %118 = arith.subf %117, %109 : vector<8x128xf32>
    %119 = arith.mulf %118, %116 : vector<8x128xf32>
    %120 = arith.mulf %109, %81 : vector<8x128xf32>
    %121 = arith.addf %119, %120 : vector<8x128xf32>
    %122 = arith.index_cast %c2_i32 : i32 to index
    %c0_40 = arith.constant 0 : index
    %c0_41 = arith.constant 0 : index
    %123 = vector.load %arg4[%122, %c0_40, %c0_41] : memref<8x8x128xf32, #tpu.memory_space<vmem>>, vector<1x8x128xf32>
    %124 = vector.shape_cast %123 : vector<1x8x128xf32> to vector<8x128xf32>
    %125 = vector.shape_cast %121 : vector<8x128xf32> to vector<1x8x128xf32>
    tpu.vector_store %arg4[%122, %c0_40, %c0_41], %125 {strides = array<i32>} : memref<8x8x128xf32, #tpu.memory_space<vmem>>, vector<1x8x128xf32>,
    %c3_i32 = arith.constant 3 : i32
    %126 = arith.index_cast %c3_i32 : i32 to index
    %c0_42 = arith.constant 0 : index
    %c0_43 = arith.constant 0 : index
    %127 = vector.load %arg1[%126, %c0_42, %c0_43] : memref<8x8x384xf32, #tpu.memory_space<vmem>>, vector<1x8x384xf32>
    %128 = vector.shape_cast %127 : vector<1x8x384xf32> to vector<8x384xf32>
    %cst_44 = arith.constant dense<0.000000e+00> : vector<8x384xf32>
    %129 = tpu.matmul %121, %3, %cst_44 {dimension_numbers = #tpu.dot_dimension_numbers<[1], [0], [0], [1], [0, 0, 1, 1], [], []>} : vector<8x128xf32>, vector<128x384xf32>, vector<8x384xf32> -> vector<8x384xf32>
    %130 = vector.extract_strided_slice %128 {offsets = [0, 0], sizes = [8, 128], strides = [1, 1]} : vector<8x384xf32> to vector<8x128xf32>
    %131 = vector.extract_strided_slice %129 {offsets = [0, 0], sizes = [8, 128], strides = [1, 1]} : vector<8x384xf32> to vector<8x128xf32>
    %132 = arith.addf %130, %131 : vector<8x128xf32>
    %cst_45 = arith.constant 5.000000e-01 : f32
    %133 = vector.broadcast %cst_45 : f32 to vector<8x128xf32>
    %134 = arith.mulf %133, %132 : vector<8x128xf32>
    %135 = math.tanh %134 : vector<8x128xf32>
    %cst_46 = arith.constant 1.000000e+00 : f32
    %136 = vector.broadcast %cst_46 : f32 to vector<8x128xf32>
    %137 = arith.addf %135, %136 : vector<8x128xf32>
    %cst_47 = arith.constant 5.000000e-01 : f32
    %138 = vector.broadcast %cst_47 : f32 to vector<8x128xf32>
    %139 = arith.mulf %138, %137 : vector<8x128xf32>
    %140 = vector.extract_strided_slice %128 {offsets = [0, 128], sizes = [8, 128], strides = [1, 1]} : vector<8x384xf32> to vector<8x128xf32>
    %141 = vector.extract_strided_slice %129 {offsets = [0, 128], sizes = [8, 128], strides = [1, 1]} : vector<8x384xf32> to vector<8x128xf32>
    %142 = arith.addf %140, %141 : vector<8x128xf32>
    %cst_48 = arith.constant 5.000000e-01 : f32
    %143 = vector.broadcast %cst_48 : f32 to vector<8x128xf32>
    %144 = arith.mulf %143, %142 : vector<8x128xf32>
    %145 = math.tanh %144 : vector<8x128xf32>
    %cst_49 = arith.constant 1.000000e+00 : f32
    %146 = vector.broadcast %cst_49 : f32 to vector<8x128xf32>
    %147 = arith.addf %145, %146 : vector<8x128xf32>
    %cst_50 = arith.constant 5.000000e-01 : f32
    %148 = vector.broadcast %cst_50 : f32 to vector<8x128xf32>
    %149 = arith.mulf %148, %147 : vector<8x128xf32>
    %150 = vector.extract_strided_slice %128 {offsets = [0, 256], sizes = [8, 128], strides = [1, 1]} : vector<8x384xf32> to vector<8x128xf32>
    %151 = vector.extract_strided_slice %129 {offsets = [0, 256], sizes = [8, 128], strides = [1, 1]} : vector<8x384xf32> to vector<8x128xf32>
    %152 = vector.broadcast %4 : vector<1x128xf32> to vector<8x128xf32>
    %153 = arith.addf %151, %152 : vector<8x128xf32>
    %154 = arith.mulf %139, %153 : vector<8x128xf32>
    %155 = arith.addf %150, %154 : vector<8x128xf32>
    %156 = math.tanh %155 : vector<8x128xf32>
    %cst_51 = arith.constant 1.000000e+00 : f32
    %157 = vector.broadcast %cst_51 : f32 to vector<8x128xf32>
    %158 = arith.subf %157, %149 : vector<8x128xf32>
    %159 = arith.mulf %158, %156 : vector<8x128xf32>
    %160 = arith.mulf %149, %121 : vector<8x128xf32>
    %161 = arith.addf %159, %160 : vector<8x128xf32>
    %162 = arith.index_cast %c3_i32 : i32 to index
    %c0_52 = arith.constant 0 : index
    %c0_53 = arith.constant 0 : index
    %163 = vector.load %arg4[%162, %c0_52, %c0_53] : memref<8x8x128xf32, #tpu.memory_space<vmem>>, vector<1x8x128xf32>
    %164 = vector.shape_cast %163 : vector<1x8x128xf32> to vector<8x128xf32>
    %165 = vector.shape_cast %161 : vector<8x128xf32> to vector<1x8x128xf32>
    tpu.vector_store %arg4[%162, %c0_52, %c0_53], %165 {strides = array<i32>} : memref<8x8x128xf32, #tpu.memory_space<vmem>>, vector<1x8x128xf32>,
    %c4_i32 = arith.constant 4 : i32
    %166 = arith.index_cast %c4_i32 : i32 to index
    %c0_54 = arith.constant 0 : index
    %c0_55 = arith.constant 0 : index
    %167 = vector.load %arg1[%166, %c0_54, %c0_55] : memref<8x8x384xf32, #tpu.memory_space<vmem>>, vector<1x8x384xf32>
    %168 = vector.shape_cast %167 : vector<1x8x384xf32> to vector<8x384xf32>
    %cst_56 = arith.constant dense<0.000000e+00> : vector<8x384xf32>
    %169 = tpu.matmul %161, %3, %cst_56 {dimension_numbers = #tpu.dot_dimension_numbers<[1], [0], [0], [1], [0, 0, 1, 1], [], []>} : vector<8x128xf32>, vector<128x384xf32>, vector<8x384xf32> -> vector<8x384xf32>
    %170 = vector.extract_strided_slice %168 {offsets = [0, 0], sizes = [8, 128], strides = [1, 1]} : vector<8x384xf32> to vector<8x128xf32>
    %171 = vector.extract_strided_slice %169 {offsets = [0, 0], sizes = [8, 128], strides = [1, 1]} : vector<8x384xf32> to vector<8x128xf32>
    %172 = arith.addf %170, %171 : vector<8x128xf32>
    %cst_57 = arith.constant 5.000000e-01 : f32
    %173 = vector.broadcast %cst_57 : f32 to vector<8x128xf32>
    %174 = arith.mulf %173, %172 : vector<8x128xf32>
    %175 = math.tanh %174 : vector<8x128xf32>
    %cst_58 = arith.constant 1.000000e+00 : f32
    %176 = vector.broadcast %cst_58 : f32 to vector<8x128xf32>
    %177 = arith.addf %175, %176 : vector<8x128xf32>
    %cst_59 = arith.constant 5.000000e-01 : f32
    %178 = vector.broadcast %cst_59 : f32 to vector<8x128xf32>
    %179 = arith.mulf %178, %177 : vector<8x128xf32>
    %180 = vector.extract_strided_slice %168 {offsets = [0, 128], sizes = [8, 128], strides = [1, 1]} : vector<8x384xf32> to vector<8x128xf32>
    %181 = vector.extract_strided_slice %169 {offsets = [0, 128], sizes = [8, 128], strides = [1, 1]} : vector<8x384xf32> to vector<8x128xf32>
    %182 = arith.addf %180, %181 : vector<8x128xf32>
    %cst_60 = arith.constant 5.000000e-01 : f32
    %183 = vector.broadcast %cst_60 : f32 to vector<8x128xf32>
    %184 = arith.mulf %183, %182 : vector<8x128xf32>
    %185 = math.tanh %184 : vector<8x128xf32>
    %cst_61 = arith.constant 1.000000e+00 : f32
    %186 = vector.broadcast %cst_61 : f32 to vector<8x128xf32>
    %187 = arith.addf %185, %186 : vector<8x128xf32>
    %cst_62 = arith.constant 5.000000e-01 : f32
    %188 = vector.broadcast %cst_62 : f32 to vector<8x128xf32>
    %189 = arith.mulf %188, %187 : vector<8x128xf32>
    %190 = vector.extract_strided_slice %168 {offsets = [0, 256], sizes = [8, 128], strides = [1, 1]} : vector<8x384xf32> to vector<8x128xf32>
    %191 = vector.extract_strided_slice %169 {offsets = [0, 256], sizes = [8, 128], strides = [1, 1]} : vector<8x384xf32> to vector<8x128xf32>
    %192 = vector.broadcast %4 : vector<1x128xf32> to vector<8x128xf32>
    %193 = arith.addf %191, %192 : vector<8x128xf32>
    %194 = arith.mulf %179, %193 : vector<8x128xf32>
    %195 = arith.addf %190, %194 : vector<8x128xf32>
    %196 = math.tanh %195 : vector<8x128xf32>
    %cst_63 = arith.constant 1.000000e+00 : f32
    %197 = vector.broadcast %cst_63 : f32 to vector<8x128xf32>
    %198 = arith.subf %197, %189 : vector<8x128xf32>
    %199 = arith.mulf %198, %196 : vector<8x128xf32>
    %200 = arith.mulf %189, %161 : vector<8x128xf32>
    %201 = arith.addf %199, %200 : vector<8x128xf32>
    %202 = arith.index_cast %c4_i32 : i32 to index
    %c0_64 = arith.constant 0 : index
    %c0_65 = arith.constant 0 : index
    %203 = vector.load %arg4[%202, %c0_64, %c0_65] : memref<8x8x128xf32, #tpu.memory_space<vmem>>, vector<1x8x128xf32>
    %204 = vector.shape_cast %203 : vector<1x8x128xf32> to vector<8x128xf32>
    %205 = vector.shape_cast %201 : vector<8x128xf32> to vector<1x8x128xf32>
    tpu.vector_store %arg4[%202, %c0_64, %c0_65], %205 {strides = array<i32>} : memref<8x8x128xf32, #tpu.memory_space<vmem>>, vector<1x8x128xf32>,
    %c5_i32 = arith.constant 5 : i32
    %206 = arith.index_cast %c5_i32 : i32 to index
    %c0_66 = arith.constant 0 : index
    %c0_67 = arith.constant 0 : index
    %207 = vector.load %arg1[%206, %c0_66, %c0_67] : memref<8x8x384xf32, #tpu.memory_space<vmem>>, vector<1x8x384xf32>
    %208 = vector.shape_cast %207 : vector<1x8x384xf32> to vector<8x384xf32>
    %cst_68 = arith.constant dense<0.000000e+00> : vector<8x384xf32>
    %209 = tpu.matmul %201, %3, %cst_68 {dimension_numbers = #tpu.dot_dimension_numbers<[1], [0], [0], [1], [0, 0, 1, 1], [], []>} : vector<8x128xf32>, vector<128x384xf32>, vector<8x384xf32> -> vector<8x384xf32>
    %210 = vector.extract_strided_slice %208 {offsets = [0, 0], sizes = [8, 128], strides = [1, 1]} : vector<8x384xf32> to vector<8x128xf32>
    %211 = vector.extract_strided_slice %209 {offsets = [0, 0], sizes = [8, 128], strides = [1, 1]} : vector<8x384xf32> to vector<8x128xf32>
    %212 = arith.addf %210, %211 : vector<8x128xf32>
    %cst_69 = arith.constant 5.000000e-01 : f32
    %213 = vector.broadcast %cst_69 : f32 to vector<8x128xf32>
    %214 = arith.mulf %213, %212 : vector<8x128xf32>
    %215 = math.tanh %214 : vector<8x128xf32>
    %cst_70 = arith.constant 1.000000e+00 : f32
    %216 = vector.broadcast %cst_70 : f32 to vector<8x128xf32>
    %217 = arith.addf %215, %216 : vector<8x128xf32>
    %cst_71 = arith.constant 5.000000e-01 : f32
    %218 = vector.broadcast %cst_71 : f32 to vector<8x128xf32>
    %219 = arith.mulf %218, %217 : vector<8x128xf32>
    %220 = vector.extract_strided_slice %208 {offsets = [0, 128], sizes = [8, 128], strides = [1, 1]} : vector<8x384xf32> to vector<8x128xf32>
    %221 = vector.extract_strided_slice %209 {offsets = [0, 128], sizes = [8, 128], strides = [1, 1]} : vector<8x384xf32> to vector<8x128xf32>
    %222 = arith.addf %220, %221 : vector<8x128xf32>
    %cst_72 = arith.constant 5.000000e-01 : f32
    %223 = vector.broadcast %cst_72 : f32 to vector<8x128xf32>
    %224 = arith.mulf %223, %222 : vector<8x128xf32>
    %225 = math.tanh %224 : vector<8x128xf32>
    %cst_73 = arith.constant 1.000000e+00 : f32
    %226 = vector.broadcast %cst_73 : f32 to vector<8x128xf32>
    %227 = arith.addf %225, %226 : vector<8x128xf32>
    %cst_74 = arith.constant 5.000000e-01 : f32
    %228 = vector.broadcast %cst_74 : f32 to vector<8x128xf32>
    %229 = arith.mulf %228, %227 : vector<8x128xf32>
    %230 = vector.extract_strided_slice %208 {offsets = [0, 256], sizes = [8, 128], strides = [1, 1]} : vector<8x384xf32> to vector<8x128xf32>
    %231 = vector.extract_strided_slice %209 {offsets = [0, 256], sizes = [8, 128], strides = [1, 1]} : vector<8x384xf32> to vector<8x128xf32>
    %232 = vector.broadcast %4 : vector<1x128xf32> to vector<8x128xf32>
    %233 = arith.addf %231, %232 : vector<8x128xf32>
    %234 = arith.mulf %219, %233 : vector<8x128xf32>
    %235 = arith.addf %230, %234 : vector<8x128xf32>
    %236 = math.tanh %235 : vector<8x128xf32>
    %cst_75 = arith.constant 1.000000e+00 : f32
    %237 = vector.broadcast %cst_75 : f32 to vector<8x128xf32>
    %238 = arith.subf %237, %229 : vector<8x128xf32>
    %239 = arith.mulf %238, %236 : vector<8x128xf32>
    %240 = arith.mulf %229, %201 : vector<8x128xf32>
    %241 = arith.addf %239, %240 : vector<8x128xf32>
    %242 = arith.index_cast %c5_i32 : i32 to index
    %c0_76 = arith.constant 0 : index
    %c0_77 = arith.constant 0 : index
    %243 = vector.load %arg4[%242, %c0_76, %c0_77] : memref<8x8x128xf32, #tpu.memory_space<vmem>>, vector<1x8x128xf32>
    %244 = vector.shape_cast %243 : vector<1x8x128xf32> to vector<8x128xf32>
    %245 = vector.shape_cast %241 : vector<8x128xf32> to vector<1x8x128xf32>
    tpu.vector_store %arg4[%242, %c0_76, %c0_77], %245 {strides = array<i32>} : memref<8x8x128xf32, #tpu.memory_space<vmem>>, vector<1x8x128xf32>,
    %c6_i32 = arith.constant 6 : i32
    %246 = arith.index_cast %c6_i32 : i32 to index
    %c0_78 = arith.constant 0 : index
    %c0_79 = arith.constant 0 : index
    %247 = vector.load %arg1[%246, %c0_78, %c0_79] : memref<8x8x384xf32, #tpu.memory_space<vmem>>, vector<1x8x384xf32>
    %248 = vector.shape_cast %247 : vector<1x8x384xf32> to vector<8x384xf32>
    %cst_80 = arith.constant dense<0.000000e+00> : vector<8x384xf32>
    %249 = tpu.matmul %241, %3, %cst_80 {dimension_numbers = #tpu.dot_dimension_numbers<[1], [0], [0], [1], [0, 0, 1, 1], [], []>} : vector<8x128xf32>, vector<128x384xf32>, vector<8x384xf32> -> vector<8x384xf32>
    %250 = vector.extract_strided_slice %248 {offsets = [0, 0], sizes = [8, 128], strides = [1, 1]} : vector<8x384xf32> to vector<8x128xf32>
    %251 = vector.extract_strided_slice %249 {offsets = [0, 0], sizes = [8, 128], strides = [1, 1]} : vector<8x384xf32> to vector<8x128xf32>
    %252 = arith.addf %250, %251 : vector<8x128xf32>
    %cst_81 = arith.constant 5.000000e-01 : f32
    %253 = vector.broadcast %cst_81 : f32 to vector<8x128xf32>
    %254 = arith.mulf %253, %252 : vector<8x128xf32>
    %255 = math.tanh %254 : vector<8x128xf32>
    %cst_82 = arith.constant 1.000000e+00 : f32
    %256 = vector.broadcast %cst_82 : f32 to vector<8x128xf32>
    %257 = arith.addf %255, %256 : vector<8x128xf32>
    %cst_83 = arith.constant 5.000000e-01 : f32
    %258 = vector.broadcast %cst_83 : f32 to vector<8x128xf32>
    %259 = arith.mulf %258, %257 : vector<8x128xf32>
    %260 = vector.extract_strided_slice %248 {offsets = [0, 128], sizes = [8, 128], strides = [1, 1]} : vector<8x384xf32> to vector<8x128xf32>
    %261 = vector.extract_strided_slice %249 {offsets = [0, 128], sizes = [8, 128], strides = [1, 1]} : vector<8x384xf32> to vector<8x128xf32>
    %262 = arith.addf %260, %261 : vector<8x128xf32>
    %cst_84 = arith.constant 5.000000e-01 : f32
    %263 = vector.broadcast %cst_84 : f32 to vector<8x128xf32>
    %264 = arith.mulf %263, %262 : vector<8x128xf32>
    %265 = math.tanh %264 : vector<8x128xf32>
    %cst_85 = arith.constant 1.000000e+00 : f32
    %266 = vector.broadcast %cst_85 : f32 to vector<8x128xf32>
    %267 = arith.addf %265, %266 : vector<8x128xf32>
    %cst_86 = arith.constant 5.000000e-01 : f32
    %268 = vector.broadcast %cst_86 : f32 to vector<8x128xf32>
    %269 = arith.mulf %268, %267 : vector<8x128xf32>
    %270 = vector.extract_strided_slice %248 {offsets = [0, 256], sizes = [8, 128], strides = [1, 1]} : vector<8x384xf32> to vector<8x128xf32>
    %271 = vector.extract_strided_slice %249 {offsets = [0, 256], sizes = [8, 128], strides = [1, 1]} : vector<8x384xf32> to vector<8x128xf32>
    %272 = vector.broadcast %4 : vector<1x128xf32> to vector<8x128xf32>
    %273 = arith.addf %271, %272 : vector<8x128xf32>
    %274 = arith.mulf %259, %273 : vector<8x128xf32>
    %275 = arith.addf %270, %274 : vector<8x128xf32>
    %276 = math.tanh %275 : vector<8x128xf32>
    %cst_87 = arith.constant 1.000000e+00 : f32
    %277 = vector.broadcast %cst_87 : f32 to vector<8x128xf32>
    %278 = arith.subf %277, %269 : vector<8x128xf32>
    %279 = arith.mulf %278, %276 : vector<8x128xf32>
    %280 = arith.mulf %269, %241 : vector<8x128xf32>
    %281 = arith.addf %279, %280 : vector<8x128xf32>
    %282 = arith.index_cast %c6_i32 : i32 to index
    %c0_88 = arith.constant 0 : index
    %c0_89 = arith.constant 0 : index
    %283 = vector.load %arg4[%282, %c0_88, %c0_89] : memref<8x8x128xf32, #tpu.memory_space<vmem>>, vector<1x8x128xf32>
    %284 = vector.shape_cast %283 : vector<1x8x128xf32> to vector<8x128xf32>
    %285 = vector.shape_cast %281 : vector<8x128xf32> to vector<1x8x128xf32>
    tpu.vector_store %arg4[%282, %c0_88, %c0_89], %285 {strides = array<i32>} : memref<8x8x128xf32, #tpu.memory_space<vmem>>, vector<1x8x128xf32>,
    %c7_i32 = arith.constant 7 : i32
    %286 = arith.index_cast %c7_i32 : i32 to index
    %c0_90 = arith.constant 0 : index
    %c0_91 = arith.constant 0 : index
    %287 = vector.load %arg1[%286, %c0_90, %c0_91] : memref<8x8x384xf32, #tpu.memory_space<vmem>>, vector<1x8x384xf32>
    %288 = vector.shape_cast %287 : vector<1x8x384xf32> to vector<8x384xf32>
    %cst_92 = arith.constant dense<0.000000e+00> : vector<8x384xf32>
    %289 = tpu.matmul %281, %3, %cst_92 {dimension_numbers = #tpu.dot_dimension_numbers<[1], [0], [0], [1], [0, 0, 1, 1], [], []>} : vector<8x128xf32>, vector<128x384xf32>, vector<8x384xf32> -> vector<8x384xf32>
    %290 = vector.extract_strided_slice %288 {offsets = [0, 0], sizes = [8, 128], strides = [1, 1]} : vector<8x384xf32> to vector<8x128xf32>
    %291 = vector.extract_strided_slice %289 {offsets = [0, 0], sizes = [8, 128], strides = [1, 1]} : vector<8x384xf32> to vector<8x128xf32>
    %292 = arith.addf %290, %291 : vector<8x128xf32>
    %cst_93 = arith.constant 5.000000e-01 : f32
    %293 = vector.broadcast %cst_93 : f32 to vector<8x128xf32>
    %294 = arith.mulf %293, %292 : vector<8x128xf32>
    %295 = math.tanh %294 : vector<8x128xf32>
    %cst_94 = arith.constant 1.000000e+00 : f32
    %296 = vector.broadcast %cst_94 : f32 to vector<8x128xf32>
    %297 = arith.addf %295, %296 : vector<8x128xf32>
    %cst_95 = arith.constant 5.000000e-01 : f32
    %298 = vector.broadcast %cst_95 : f32 to vector<8x128xf32>
    %299 = arith.mulf %298, %297 : vector<8x128xf32>
    %300 = vector.extract_strided_slice %288 {offsets = [0, 128], sizes = [8, 128], strides = [1, 1]} : vector<8x384xf32> to vector<8x128xf32>
    %301 = vector.extract_strided_slice %289 {offsets = [0, 128], sizes = [8, 128], strides = [1, 1]} : vector<8x384xf32> to vector<8x128xf32>
    %302 = arith.addf %300, %301 : vector<8x128xf32>
    %cst_96 = arith.constant 5.000000e-01 : f32
    %303 = vector.broadcast %cst_96 : f32 to vector<8x128xf32>
    %304 = arith.mulf %303, %302 : vector<8x128xf32>
    %305 = math.tanh %304 : vector<8x128xf32>
    %cst_97 = arith.constant 1.000000e+00 : f32
    %306 = vector.broadcast %cst_97 : f32 to vector<8x128xf32>
    %307 = arith.addf %305, %306 : vector<8x128xf32>
    %cst_98 = arith.constant 5.000000e-01 : f32
    %308 = vector.broadcast %cst_98 : f32 to vector<8x128xf32>
    %309 = arith.mulf %308, %307 : vector<8x128xf32>
    %310 = vector.extract_strided_slice %288 {offsets = [0, 256], sizes = [8, 128], strides = [1, 1]} : vector<8x384xf32> to vector<8x128xf32>
    %311 = vector.extract_strided_slice %289 {offsets = [0, 256], sizes = [8, 128], strides = [1, 1]} : vector<8x384xf32> to vector<8x128xf32>
    %312 = vector.broadcast %4 : vector<1x128xf32> to vector<8x128xf32>
    %313 = arith.addf %311, %312 : vector<8x128xf32>
    %314 = arith.mulf %299, %313 : vector<8x128xf32>
    %315 = arith.addf %310, %314 : vector<8x128xf32>
    %316 = math.tanh %315 : vector<8x128xf32>
    %cst_99 = arith.constant 1.000000e+00 : f32
    %317 = vector.broadcast %cst_99 : f32 to vector<8x128xf32>
    %318 = arith.subf %317, %309 : vector<8x128xf32>
    %319 = arith.mulf %318, %316 : vector<8x128xf32>
    %320 = arith.mulf %309, %281 : vector<8x128xf32>
    %321 = arith.addf %319, %320 : vector<8x128xf32>
    %322 = arith.index_cast %c7_i32 : i32 to index
    %c0_100 = arith.constant 0 : index
    %c0_101 = arith.constant 0 : index
    %323 = vector.load %arg4[%322, %c0_100, %c0_101] : memref<8x8x128xf32, #tpu.memory_space<vmem>>, vector<1x8x128xf32>
    %324 = vector.shape_cast %323 : vector<1x8x128xf32> to vector<8x128xf32>
    %325 = vector.shape_cast %321 : vector<8x128xf32> to vector<1x8x128xf32>
    tpu.vector_store %arg4[%322, %c0_100, %c0_101], %325 {strides = array<i32>} : memref<8x8x128xf32, #tpu.memory_space<vmem>>, vector<1x8x128xf32>,
    %c8_i32 = arith.constant 8 : i32
    %c0_102 = arith.constant 0 : index
    %c0_103 = arith.constant 0 : index
    %326 = vector.load %arg5[%c0_102, %c0_103] : memref<8x128xf32, #tpu.memory_space<vmem>>, vector<8x128xf32>
    tpu.vector_store %arg5[%c0_102, %c0_103], %321 {strides = array<i32>} : memref<8x128xf32, #tpu.memory_space<vmem>>, vector<8x128xf32>,
    return
  }
  func.func @transform_0(%arg0: i32) -> (i32, i32, i32) {
    %c0_i32 = arith.constant 0 : i32
    %c0_i32_0 = arith.constant 0 : i32
    %c0_i32_1 = arith.constant 0 : i32
    return %arg0, %c0_i32, %c0_i32_0 : i32, i32, i32
  }
  func.func @transform_1(%arg0: i32) -> (i32, i32) {
    %c0_i32 = arith.constant 0 : i32
    %c0_i32_0 = arith.constant 0 : i32
    %c0_i32_1 = arith.constant 0 : i32
    return %c0_i32, %c0_i32_0 : i32, i32
  }
  func.func @transform_2(%arg0: i32) -> (i32, i32) {
    %c0_i32 = arith.constant 0 : i32
    %c0_i32_0 = arith.constant 0 : i32
    %c0_i32_1 = arith.constant 0 : i32
    return %c0_i32, %c0_i32_0 : i32, i32
  }
  func.func @transform_3(%arg0: i32) -> (i32, i32, i32) {
    %c0_i32 = arith.constant 0 : i32
    %c0_i32_0 = arith.constant 0 : i32
    %c0_i32_1 = arith.constant 0 : i32
    return %arg0, %c0_i32, %c0_i32_0 : i32, i32, i32
  }
}

</mosaic_0001>

<bundles_post_ra>
// kernel: patient_rnn_encoder.1
= control target key start
LH: loop header
LB: loop body
LE: loop exit
PB: predicated region body
PF: predicated region fallthrough
CT: control target
= control target key end

     0   :  { %v2342_v3 = vmov 0.0|0.0   ;;  %v2343_v4 = vmov 0.0   ;;  %vm2344_vm0 = vmmov 0   ;;  %s2978_s1 = inlined_call_operand.vmem [shape: f32[128,384], index: 1, kind: input, shape index: {}]   ;;  %s2979_s0 = inlined_call_operand.vmem [shape: f32[8,8,384], index: 0, kind: input, shape index: {}]   ;;  %s2980_s2 = inlined_call_operand.vmem [shape: f32[1,128], index: 2, kind: input, shape index: {}]   ;;  %s2981_s3 = inlined_call_operand.vmem [shape: f32[8,8,128], index: 3, kind: output, shape index: {}]  }
   0x1   :  { %v20_v0 = vld [vmem:[%s2978_s1 + $0x8] sm:$0xff]  ;;  %v23_v1 = vld [vmem:[%s2978_s1 + $0x20] sm:$0xff]  ;;  %1875 = vmatprep.subr.bf16.mxu1 %v2342_v3  ;;  %136 = vmatprep.mubr.f32.mxu0 %v2343_v4  ;;  %v22_v6 = vld [vmem:[%s2978_s1 + $0x18] sm:$0xff] }
   0x2   :  { %v19_v2 = vld [vmem:[%s2978_s1] sm:$0xff]  ;;  %v2376_v5 = vpack.c.bf16 %v23_v1, %v20_v0  ;;  %v26_v7 = vld [vmem:[%s2978_s1 + $0x38] sm:$0xff]  ;;  %v29_v8 = vld [vmem:[%s2978_s1 + $0x50] sm:$0xff]  ;;  %1595 = vmatprep.mubr.msk.f32.mxu1 %vm2344_vm0, %v2343_v4 }
   0x3   :  { %v2389_v9 = vpack.c.bf16 %v22_v6, %v19_v2  ;;  %v2391_v10 = vpack.c.bf16 %v29_v8, %v26_v7  ;;  %v25_v11 = vld [vmem:[%s2978_s1 + $0x30] sm:$0xff]  ;;  %v28_v12 = vld [vmem:[%s2978_s1 + $0x48] sm:$0xff]  ;;  %v35_v14 = vld [vmem:[%s2978_s1 + $0x80] sm:$0xff] }
   0x4   :  { %v32_v13 = vld [vmem:[%s2978_s1 + $0x68] sm:$0xff]  ;;  %1844 = vmatprep.subr.bf16.mxu0 %v2376_v5  ;;  %v2407_v15 = vpack.c.bf16 %v28_v12, %v25_v11  ;;  %v31_v17 = vld [vmem:[%s2978_s1 + $0x60] sm:$0xff]  ;;  %v34_v18 = vld [vmem:[%s2978_s1 + $0x78] sm:$0xff] }
   0x5   :  { %1846 = vmatpush1.bf16.msra.mxu0 %v2389_v9  ;;  %v2410_v16 = vpack.c.bf16 %v35_v14, %v32_v13  ;;  %v38_v19 = vld [vmem:[%s2978_s1 + $0x98] sm:$0xff]  ;;  %v41_v20 = vld [vmem:[%s2978_s1 + $0xb0] sm:$0xff]  ;;  %v24_v22 = vld [vmem:[%s2978_s1 + $0x28] sm:$0xff]  ;;  %v2431_v23 = vpack.c.bf16 %v34_v18, %v31_v17 }
   0x6   :  { %1848 = vmatprep.subr.bf16.mxu0 %v2391_v10  ;;  %v21_v21 = vld [vmem:[%s2978_s1 + $0x10] sm:$0xff]  ;;  %v27_v25 = vld [vmem:[%s2978_s1 + $0x40] sm:$0xff]  ;;  %v2439_v26 = vpack.c.bf16 %v41_v20, %v38_v19  ;;  %v40_v28 = vld [vmem:[%s2978_s1 + $0xa8] sm:$0xff] }
   0x7   :  { %v2433_v24 = vpack.c.bf16 %v24_v22, %v21_v21  ;;  %v37_v27 = vld [vmem:[%s2978_s1 + $0x90] sm:$0xff]  ;;  %v30_v29 = vld [vmem:[%s2978_s1 + $0x58] sm:$0xff]  ;;  %v44_v30 = vld [vmem:[%s2978_s1 + $0xc8] sm:$0xff] }
   0x8   :  { %v47_v31 = vld [vmem:[%s2978_s1 + $0xe0] sm:$0xff]  ;;  %v2457_v32 = vpack.c.bf16 %v30_v29, %v27_v25  ;;  %v33_v33 = vld [vmem:[%s2978_s1 + $0x70] sm:$0xff]  ;;  %v36_v34 = vld [vmem:[%s2978_s1 + $0x88] sm:$0xff]  ;;  %v2467_v35 = vpack.c.bf16 %v40_v28, %v37_v27 }
   0x9   :  { %1850 = vmatpush1.bf16.msra.mxu0 %v2407_v15  ;;  %1877 = vmatpush3.bf16.msra.mxu1 %v2433_v24  ;;  %v2470_v36 = vpack.c.bf16 %v47_v31, %v44_v30  ;;  %v43_v37 = vld [vmem:[%s2978_s1 + $0xc0] sm:$0xff]  ;;  %v46_v38 = vld [vmem:[%s2978_s1 + $0xd8] sm:$0xff]  ;;  %v53_v40 = vld [vmem:[%s2978_s1 + $0x110] sm:$0xff]  ;;  %v2485_v41 = vpack.c.bf16 %v36_v34, %v33_v33 }
   0xa   :  { %1852 = vmatprep.subr.bf16.mxu0 %v2410_v16  ;;  %1878 = vmatprep.subr.bf16.mxu1 %v2342_v3  ;;  %v50_v39 = vld [vmem:[%s2978_s1 + $0xf8] sm:$0xff]  ;;  %v39_v42 = vld [vmem:[%s2978_s1 + $0xa0] sm:$0xff]  ;;  %v2495_v44 = vpack.c.bf16 %v46_v38, %v43_v37  ;;  %v49_v46 = vld [vmem:[%s2978_s1 + $0xf0] sm:$0xff] }
   0xb   :  { %v42_v43 = vld [vmem:[%s2978_s1 + $0xb8] sm:$0xff]  ;;  %v2498_v45 = vpack.c.bf16 %v53_v40, %v50_v39  ;;  %v52_v47 = vld [vmem:[%s2978_s1 + $0x108] sm:$0xff]  ;;  %v59_v49 = vld [vmem:[%s2978_s1 + $0x140] sm:$0xff] }
   0xc   :  { %v56_v48 = vld [vmem:[%s2978_s1 + $0x128] sm:$0xff]  ;;  %v2513_v50 = vpack.c.bf16 %v42_v43, %v39_v42  ;;  %v45_v51 = vld [vmem:[%s2978_s1 + $0xd0] sm:$0xff]  ;;  %v2523_v53 = vpack.c.bf16 %v52_v47, %v49_v46  ;;  %v55_v55 = vld [vmem:[%s2978_s1 + $0x120] sm:$0xff] }
   0xd   :  { %1854 = vmatpush1.bf16.msra.mxu0 %v2431_v23  ;;  %1880 = vmatpush3.bf16.msra.mxu1 %v2457_v32  ;;  %v48_v52 = vld [vmem:[%s2978_s1 + $0xe8] sm:$0xff]  ;;  %v2526_v54 = vpack.c.bf16 %v59_v49, %v56_v48  ;;  %v58_v56 = vld [vmem:[%s2978_s1 + $0x138] sm:$0xff]  ;;  %v65_v58 = vld [vmem:[%s2978_s1 + $0x170] sm:$0xff] }
   0xe   :  { %1856 = vmatprep.subr.bf16.mxu0 %v2439_v26  ;;  %1881 = vmatprep.subr.bf16.mxu1 %v2342_v3  ;;  %v62_v57 = vld [vmem:[%s2978_s1 + $0x158] sm:$0xff]  ;;  %v2541_v59 = vpack.c.bf16 %v48_v52, %v45_v51  ;;  %v51_v60 = vld [vmem:[%s2978_s1 + $0x100] sm:$0xff]  ;;  %v2551_v62 = vpack.c.bf16 %v58_v56, %v55_v55  ;;  %v61_v0 = vld [vmem:[%s2978_s1 + $0x150] sm:$0xff] }
   0xf   :  { %v54_v61 = vld [vmem:[%s2978_s1 + $0x118] sm:$0xff]  ;;  %v2554_v63 = vpack.c.bf16 %v65_v58, %v62_v57  ;;  %v64_v1 = vld [vmem:[%s2978_s1 + $0x168] sm:$0xff]  ;;  %v57_v6 = vld [vmem:[%s2978_s1 + $0x130] sm:$0xff] }
  0x10   :  { %v2563_v2 = vpack.c.bf16 %v54_v61, %v51_v60  ;;  %v60_v7 = vld [vmem:[%s2978_s1 + $0x148] sm:$0xff]  ;;  %v2573_v8 = vpack.c.bf16 %v64_v1, %v61_v0  ;;  %v63_v12 = vld [vmem:[%s2978_s1 + $0x160] sm:$0xff]  ;;  %v66_v13 = vld [vmem:[%s2978_s1 + $0x178] sm:$0xff] }
  0x11   :  { %1858 = vmatpush1.bf16.msra.mxu0 %v2467_v35  ;;  %1883 = vmatpush3.bf16.msra.mxu1 %v2485_v41  ;;  %v2577_v11 = vpack.c.bf16 %v60_v7, %v57_v6  ;;  %v2589_v14 = vpack.c.bf16 %v66_v13, %v63_v12  ;;  %v69_v17 = vld [vmem:[%s2979_s0] sm:$0xff]  ;;  %v70_v20 = vld [vmem:[%s2979_s0 + $0x8] sm:$0xff]  ;;  %v71_v38 = vld [vmem:[%s2979_s0 + $0x10] sm:$0xff] }
  0x12   :  { %1860 = vmatprep.subr.bf16.mxu0 %v2470_v36  ;;  %1884 = vmatprep.subr.bf16.mxu1 %v2342_v3  ;;  %v2640_v30 = vld [vmem:[%s2980_s2] ss:$0 sm:$0xff]  ;;  %v1399_v55 = vld [vmem:[%s2979_s0 + $0x18] sm:$0xff] }
  0x13   :  { %v1400_v60 = vld [vmem:[%s2979_s0 + $0x20] sm:$0xff] }
  0x15   :  { %1862 = vmatpush1.bf16.msra.mxu0 %v2495_v44  ;;  %1886 = vmatpush3.bf16.msra.mxu1 %v2513_v50 }
  0x16   :  { %1864 = vmatprep.subr.bf16.mxu0 %v2498_v45  ;;  %1887 = vmatprep.subr.bf16.mxu1 %v2342_v3 }
  0x19   :  { %1866 = vmatpush1.bf16.msra.mxu0 %v2523_v53  ;;  %1889 = vmatpush3.bf16.msra.mxu1 %v2541_v59 }
  0x1a   :  { %1868 = vmatprep.subr.bf16.mxu0 %v2526_v54  ;;  %1890 = vmatprep.subr.bf16.mxu1 %v2342_v3 }
  0x1d   :  { %1870 = vmatpush1.bf16.msra.mxu0 %v2551_v62  ;;  %1892 = vmatpush3.bf16.msra.mxu1 %v2563_v2 }
  0x1e   :  { %1872 = vmatprep.subr.bf16.mxu0 %v2554_v63  ;;  %1893 = vmatprep.subr.bf16.mxu1 %v2342_v3 }
  0x21   :  { %1874 = vmatpush1.bf16.msra.mxu0 %v2573_v8  ;;  %1895 = vmatpush3.bf16.msra.mxu1 %v2577_v11 }
  0x22   :  { %1900 = vmatprep.subr.bf16.mxu0 %v2376_v5  ;;  %1896 = vmatprep.subr.bf16.mxu1 %v2342_v3 }
  0x24   :  { %137 = vmatmul.mubr.f32.vlgmr.msra.gmra.mrb[0].mxu0 %v2343_v4 }
  0x25   :  { %1902 = vmatpush1.bf16.msra.mxu0 %v2389_v9  ;;  %306 = vmatprep.mubr.f32.mxu0 %v2343_v4 }
  0x26   :  { %1904 = vmatprep.subr.bf16.mxu0 %v2391_v10  ;;  %1898 = vmatpush3.bf16.msra.mxu1 %v2589_v14 }
  0x27   :  { %1931 = vmatprep.subr.bf16.mxu1 %v2342_v3 }
  0x29   :  { %1906 = vmatpush1.bf16.msra.mxu0 %v2407_v15  ;;  %1596 = vmatmul.mubr.f32.vlgmr.msra.gmra.mrb[0].mxu1 %v2343_v4 }
  0x2a   :  { %1908 = vmatprep.subr.bf16.mxu0 %v2410_v16  ;;  %1933 = vmatpush3.bf16.msra.mxu1 %v2433_v24 }
  0x2b   :  { %1630 = vmatprep.mubr.msk.f32.mxu1 %vm2344_vm0, %v2343_v4  ;;  %1934 = vmatprep.subr.bf16.mxu1 %v2342_v3 }
  0x2d   :  { %1910 = vmatpush1.bf16.msra.mxu0 %v2431_v23 }
  0x2e   :  { %1912 = vmatprep.subr.bf16.mxu0 %v2439_v26  ;;  %1936 = vmatpush3.bf16.msra.mxu1 %v2457_v32 }
  0x2f   :  { %1937 = vmatprep.subr.bf16.mxu1 %v2342_v3 }
  0x31   :  { %1914 = vmatpush1.bf16.msra.mxu0 %v2467_v35 }
  0x32   :  { %1916 = vmatprep.subr.bf16.mxu0 %v2470_v36  ;;  %1939 = vmatpush3.bf16.msra.mxu1 %v2485_v41 }
  0x33   :  { %1940 = vmatprep.subr.bf16.mxu1 %v2342_v3 }
  0x35   :  { %1918 = vmatpush1.bf16.msra.mxu0 %v2495_v44 }
  0x36   :  { %1920 = vmatprep.subr.bf16.mxu0 %v2498_v45  ;;  %1942 = vmatpush3.bf16.msra.mxu1 %v2513_v50 }
  0x37   :  { %1943 = vmatprep.subr.bf16.mxu1 %v2342_v3 }
  0x39   :  { %1922 = vmatpush1.bf16.msra.mxu0 %v2523_v53 }
  0x3a   :  { %1924 = vmatprep.subr.bf16.mxu0 %v2526_v54  ;;  %1945 = vmatpush3.bf16.msra.mxu1 %v2541_v59 }
  0x3b   :  { %1946 = vmatprep.subr.bf16.mxu1 %v2342_v3 }
  0x3d   :  { %1926 = vmatpush1.bf16.msra.mxu0 %v2551_v62 }
  0x3e   :  { %1928 = vmatprep.subr.bf16.mxu0 %v2554_v63  ;;  %1948 = vmatpush3.bf16.msra.mxu1 %v2563_v2 }
  0x3f   :  { %1949 = vmatprep.subr.bf16.mxu1 %v2342_v3 }
  0x41   :  { %1930 = vmatpush1.bf16.msra.mxu0 %v2573_v8 }
  0x42   :  { %1956 = vmatprep.subr.bf16.mxu0 %v2376_v5  ;;  %1951 = vmatpush3.bf16.msra.mxu1 %v2577_v11 }
  0x43   :  { %1952 = vmatprep.subr.bf16.mxu1 %v2342_v3 }
  0x46   :  { %1954 = vmatpush3.bf16.msra.mxu1 %v2589_v14 }
  0x47   :  { %1987 = vmatprep.subr.bf16.mxu1 %v2342_v3 }
  0xf7   :  { %v138_v18 = vpop.f32.mrb[0].mxu0 }
  0xf8   :  { %v213_v19 = vadd.f32 %v138_v18, %v69_v17  ;;  %v140_v21 = vpop.f32.mrb[1].mxu0 }
  0xf9   :  { %v218_v25 = vadd.f32 %v140_v21, %v70_v20 }
  0xfa   :  { %v214_v22 = vmul.f32 0.5, %v213_v19  ;;  %v1401_v19 = vld [vmem:[%s2979_s0 + $0x28] sm:$0xff] }
  0xfb   :  { %v219_v29 = vmul.f32 0.5, %v218_v25 }
  0xfc   :  { %2294 = vtanh.f32 %v214_v22  ;;  %v209_v27 = vpop.f32.mrb[0].mxu1 }
  0xfd   :  { %v1597_v28 = vpop.f32.mrb[1].mxu1  ;;  %2296 = vtanh.f32 %v219_v29  ;;  %v229_v34 = vadd.f32 %v2640_v30, %v209_v27 }
 0x106   :  { %v2295_v31 = vpop.eup %2294 }
 0x107   :  { %v216_v33 = vadd.f32 1.0, %v2295_v31  ;;  %v2297_v40 = vpop.eup %2296 }
 0x108   :  { %v221_v43 = vadd.f32 1.0, %v2297_v40 }
 0x109   :  { %v217_v37 = vmul.f32 0.5, %v216_v33 }
 0x10a   :  { %v222_v46 = vmul.f32 0.5, %v221_v43 }
 0x10b   :  { %v230_v39 = vmul.f32 %v229_v34, %v217_v37  ;;  %v1403_v37 = vld [vmem:[%s2979_s0 + $0x30] sm:$0xff] }
 0x10c   :  { %v233_v47 = vsub.f32 1.0, %v222_v46  ;;  %v235_v49 = vmul.f32 0.0, %v222_v46 }
 0x10d   :  { %v231_v42 = vadd.f32 %v230_v39, %v71_v38 }
 0x10f   :  { %2298 = vtanh.f32 %v231_v42  ;;  %v1404_v42 = vld [vmem:[%s2979_s0 + $0x38] sm:$0xff] }
 0x119   :  { %v2299_v48 = vpop.eup %2298 }
 0x11a   :  { %v234_v51 = vmul.f32 %v2299_v48, %v233_v47 }
 0x11c   :  { %v2646_v52 = vadd.f32 %v235_v49, %v234_v51 }
 0x11e   :  { %237 = vst [vmem:[%s2981_s3] sm:$0xff] %v2646_v52  ;;  %307 = vmatmul.mubr.f32.vlgmr.msra.gmra.mrb[2].mxu0 %v2646_v52  ;;  %1631 = vmatmul.mubr.f32.vlgmr.msra.gmra.mrb[2].mxu1 %v2646_v52 }
 0x11f   :  { %1958 = vmatpush1.bf16.msra.mxu0 %v2389_v9  ;;  %1989 = vmatpush3.bf16.msra.mxu1 %v2433_v24 }
 0x120   :  { %1960 = vmatprep.subr.bf16.mxu0 %v2391_v10  ;;  %1990 = vmatprep.subr.bf16.mxu1 %v2342_v3 }
 0x121   :  { %471 = vmatprep.mubr.f32.mxu0 %v2343_v4  ;;  %1665 = vmatprep.mubr.msk.f32.mxu1 %vm2344_vm0, %v2343_v4 }
 0x123   :  { %1962 = vmatpush1.bf16.msra.mxu0 %v2407_v15  ;;  %1992 = vmatpush3.bf16.msra.mxu1 %v2457_v32 }
 0x124   :  { %1964 = vmatprep.subr.bf16.mxu0 %v2410_v16  ;;  %1993 = vmatprep.subr.bf16.mxu1 %v2342_v3 }
 0x127   :  { %1966 = vmatpush1.bf16.msra.mxu0 %v2431_v23  ;;  %1995 = vmatpush3.bf16.msra.mxu1 %v2485_v41 }
 0x128   :  { %1968 = vmatprep.subr.bf16.mxu0 %v2439_v26  ;;  %1996 = vmatprep.subr.bf16.mxu1 %v2342_v3 }
 0x12b   :  { %1970 = vmatpush1.bf16.msra.mxu0 %v2467_v35  ;;  %1998 = vmatpush3.bf16.msra.mxu1 %v2513_v50 }
 0x12c   :  { %1972 = vmatprep.subr.bf16.mxu0 %v2470_v36  ;;  %1999 = vmatprep.subr.bf16.mxu1 %v2342_v3 }
 0x12f   :  { %1974 = vmatpush1.bf16.msra.mxu0 %v2495_v44  ;;  %2001 = vmatpush3.bf16.msra.mxu1 %v2541_v59 }
 0x130   :  { %1976 = vmatprep.subr.bf16.mxu0 %v2498_v45  ;;  %2002 = vmatprep.subr.bf16.mxu1 %v2342_v3 }
 0x133   :  { %1978 = vmatpush1.bf16.msra.mxu0 %v2523_v53  ;;  %2004 = vmatpush3.bf16.msra.mxu1 %v2563_v2 }
 0x134   :  { %1980 = vmatprep.subr.bf16.mxu0 %v2526_v54  ;;  %2005 = vmatprep.subr.bf16.mxu1 %v2342_v3 }
 0x137   :  { %1982 = vmatpush1.bf16.msra.mxu0 %v2551_v62  ;;  %2007 = vmatpush3.bf16.msra.mxu1 %v2577_v11 }
 0x138   :  { %1984 = vmatprep.subr.bf16.mxu0 %v2554_v63  ;;  %2008 = vmatprep.subr.bf16.mxu1 %v2342_v3 }
 0x13b   :  { %1986 = vmatpush1.bf16.msra.mxu0 %v2573_v8  ;;  %2010 = vmatpush3.bf16.msra.mxu1 %v2589_v14 }
 0x13c   :  { %2012 = vmatprep.subr.bf16.mxu0 %v2376_v5  ;;  %2043 = vmatprep.subr.bf16.mxu1 %v2342_v3 }
 0x1f1   :  { %v308_v56 = vpop.f32.mrb[2].mxu0  ;;  %v379_v57 = vpop.f32.mrb[2].mxu1 }
 0x1f2   :  { %v383_v58 = vadd.f32 %v1399_v55, %v308_v56  ;;  %v310_v61 = vpop.f32.mrb[3].mxu0  ;;  %v1632_v0 = vpop.f32.mrb[3].mxu1  ;;  %v393_v18 = vadd.f32 %v2640_v30, %v379_v57  ;;  %v1405_v57 = vld [vmem:[%s2979_s0 + $0x40] sm:$0xff] }
 0x1f3   :  { %v388_v6 = vadd.f32 %v1400_v60, %v310_v61 }
 0x1f4   :  { %v384_v1 = vmul.f32 0.5, %v383_v58 }
 0x1f5   :  { %v389_v7 = vmul.f32 0.5, %v388_v6 }
 0x1f6   :  { %2300 = vtanh.f32 %v384_v1 }
 0x1f7   :  { %2302 = vtanh.f32 %v389_v7 }
 0x200   :  { %v2301_v12 = vpop.eup %2300 }
 0x201   :  { %v386_v13 = vadd.f32 1.0, %v2301_v12  ;;  %v2303_v21 = vpop.eup %2302 }
 0x202   :  { %v391_v25 = vadd.f32 1.0, %v2303_v21 }
 0x203   :  { %v387_v17 = vmul.f32 0.5, %v386_v13 }
 0x204   :  { %v392_v27 = vmul.f32 0.5, %v391_v25 }
 0x205   :  { %v394_v20 = vmul.f32 %v393_v18, %v387_v17  ;;  %v1407_v18 = vld [vmem:[%s2979_s0 + $0x48] sm:$0xff] }
 0x206   :  { %v397_v28 = vsub.f32 1.0, %v392_v27  ;;  %v399_v33 = vmul.f32 %v392_v27, %v2646_v52 }
 0x207   :  { %v395_v22 = vadd.f32 %v1401_v19, %v394_v20 }
 0x209   :  { %2304 = vtanh.f32 %v395_v22  ;;  %v1408_v22 = vld [vmem:[%s2979_s0 + $0x50] sm:$0xff] }
 0x213   :  { %v2305_v29 = vpop.eup %2304 }
 0x214   :  { %v398_v31 = vmul.f32 %v2305_v29, %v397_v28 }
 0x216   :  { %v2700_v34 = vadd.f32 %v399_v33, %v398_v31 }
 0x218   :  { %1402 = vst [vmem:[%s2981_s3 + $0x8] sm:$0xff] %v2700_v34  ;;  %472 = vmatmul.mubr.f32.vlgmr.msra.gmra.mrb[4].mxu0 %v2700_v34  ;;  %1666 = vmatmul.mubr.f32.vlgmr.msra.gmra.mrb[4].mxu1 %v2700_v34 }
 0x219   :  { %2014 = vmatpush1.bf16.msra.mxu0 %v2389_v9  ;;  %2045 = vmatpush3.bf16.msra.mxu1 %v2433_v24 }
 0x21a   :  { %2016 = vmatprep.subr.bf16.mxu0 %v2391_v10  ;;  %2046 = vmatprep.subr.bf16.mxu1 %v2342_v3 }
 0x21b   :  { %636 = vmatprep.mubr.f32.mxu0 %v2343_v4  ;;  %1700 = vmatprep.mubr.msk.f32.mxu1 %vm2344_vm0, %v2343_v4 }
 0x21d   :  { %2018 = vmatpush1.bf16.msra.mxu0 %v2407_v15  ;;  %2048 = vmatpush3.bf16.msra.mxu1 %v2457_v32 }
 0x21e   :  { %2020 = vmatprep.subr.bf16.mxu0 %v2410_v16  ;;  %2049 = vmatprep.subr.bf16.mxu1 %v2342_v3 }
 0x221   :  { %2022 = vmatpush1.bf16.msra.mxu0 %v2431_v23  ;;  %2051 = vmatpush3.bf16.msra.mxu1 %v2485_v41 }
 0x222   :  { %2024 = vmatprep.subr.bf16.mxu0 %v2439_v26  ;;  %2052 = vmatprep.subr.bf16.mxu1 %v2342_v3 }
 0x225   :  { %2026 = vmatpush1.bf16.msra.mxu0 %v2467_v35  ;;  %2054 = vmatpush3.bf16.msra.mxu1 %v2513_v50 }
 0x226   :  { %2028 = vmatprep.subr.bf16.mxu0 %v2470_v36  ;;  %2055 = vmatprep.subr.bf16.mxu1 %v2342_v3 }
 0x229   :  { %2030 = vmatpush1.bf16.msra.mxu0 %v2495_v44  ;;  %2057 = vmatpush3.bf16.msra.mxu1 %v2541_v59 }
 0x22a   :  { %2032 = vmatprep.subr.bf16.mxu0 %v2498_v45  ;;  %2058 = vmatprep.subr.bf16.mxu1 %v2342_v3 }
 0x22d   :  { %2034 = vmatpush1.bf16.msra.mxu0 %v2523_v53  ;;  %2060 = vmatpush3.bf16.msra.mxu1 %v2563_v2 }
 0x22e   :  { %2036 = vmatprep.subr.bf16.mxu0 %v2526_v54  ;;  %2061 = vmatprep.subr.bf16.mxu1 %v2342_v3 }
 0x231   :  { %2038 = vmatpush1.bf16.msra.mxu0 %v2551_v62  ;;  %2063 = vmatpush3.bf16.msra.mxu1 %v2577_v11 }
 0x232   :  { %2040 = vmatprep.subr.bf16.mxu0 %v2554_v63  ;;  %2064 = vmatprep.subr.bf16.mxu1 %v2342_v3 }
 0x235   :  { %2042 = vmatpush1.bf16.msra.mxu0 %v2573_v8  ;;  %2066 = vmatpush3.bf16.msra.mxu1 %v2589_v14 }
 0x236   :  { %2068 = vmatprep.subr.bf16.mxu0 %v2376_v5  ;;  %2099 = vmatprep.subr.bf16.mxu1 %v2342_v3 }
 0x2eb   :  { %v473_v38 = vpop.f32.mrb[4].mxu0  ;;  %v544_v39 = vpop.f32.mrb[4].mxu1 }
 0x2ec   :  { %v548_v40 = vadd.f32 %v1403_v37, %v473_v38  ;;  %v475_v43 = vpop.f32.mrb[5].mxu0  ;;  %v1667_v46 = vpop.f32.mrb[5].mxu1  ;;  %v558_v56 = vadd.f32 %v2640_v30, %v544_v39  ;;  %v1409_v39 = vld [vmem:[%s2979_s0 + $0x58] sm:$0xff] }
 0x2ed   :  { %v553_v48 = vadd.f32 %v1404_v42, %v475_v43 }
 0x2ee   :  { %v549_v47 = vmul.f32 0.5, %v548_v40 }
 0x2ef   :  { %v554_v49 = vmul.f32 0.5, %v553_v48 }
 0x2f0   :  { %2306 = vtanh.f32 %v549_v47 }
 0x2f1   :  { %2308 = vtanh.f32 %v554_v49 }
 0x2fa   :  { %v2307_v51 = vpop.eup %2306 }
 0x2fb   :  { %v551_v52 = vadd.f32 1.0, %v2307_v51  ;;  %v2309_v60 = vpop.eup %2308 }
 0x2fc   :  { %v556_v0 = vadd.f32 1.0, %v2309_v60 }
 0x2fd   :  { %v552_v55 = vmul.f32 0.5, %v551_v52 }
 0x2fe   :  { %v557_v1 = vmul.f32 0.5, %v556_v0 }
 0x2ff   :  { %v559_v58 = vmul.f32 %v558_v56, %v552_v55  ;;  %v1411_v56 = vld [vmem:[%s2979_s0 + $0x60] sm:$0xff] }
 0x300   :  { %v562_v6 = vsub.f32 1.0, %v557_v1  ;;  %v564_v13 = vmul.f32 %v557_v1, %v2700_v34 }
 0x301   :  { %v560_v61 = vadd.f32 %v1405_v57, %v559_v58 }
 0x303   :  { %2310 = vtanh.f32 %v560_v61  ;;  %v1412_v61 = vld [vmem:[%s2979_s0 + $0x68] sm:$0xff] }
 0x30d   :  { %v2311_v7 = vpop.eup %2310 }
 0x30e   :  { %v563_v12 = vmul.f32 %v2311_v7, %v562_v6 }
 0x310   :  { %v2754_v17 = vadd.f32 %v564_v13, %v563_v12 }
 0x312   :  { %1406 = vst [vmem:[%s2981_s3 + $0x10] sm:$0xff] %v2754_v17  ;;  %637 = vmatmul.mubr.f32.vlgmr.msra.gmra.mrb[6].mxu0 %v2754_v17  ;;  %1701 = vmatmul.mubr.f32.vlgmr.msra.gmra.mrb[6].mxu1 %v2754_v17 }
 0x313   :  { %2070 = vmatpush1.bf16.msra.mxu0 %v2389_v9  ;;  %2101 = vmatpush3.bf16.msra.mxu1 %v2433_v24 }
 0x314   :  { %2072 = vmatprep.subr.bf16.mxu0 %v2391_v10  ;;  %2102 = vmatprep.subr.bf16.mxu1 %v2342_v3 }
 0x315   :  { %801 = vmatprep.mubr.f32.mxu0 %v2343_v4  ;;  %1735 = vmatprep.mubr.msk.f32.mxu1 %vm2344_vm0, %v2343_v4 }
 0x317   :  { %2074 = vmatpush1.bf16.msra.mxu0 %v2407_v15  ;;  %2104 = vmatpush3.bf16.msra.mxu1 %v2457_v32 }
 0x318   :  { %2076 = vmatprep.subr.bf16.mxu0 %v2410_v16  ;;  %2105 = vmatprep.subr.bf16.mxu1 %v2342_v3 }
 0x31b   :  { %2078 = vmatpush1.bf16.msra.mxu0 %v2431_v23  ;;  %2107 = vmatpush3.bf16.msra.mxu1 %v2485_v41 }
 0x31c   :  { %2080 = vmatprep.subr.bf16.mxu0 %v2439_v26  ;;  %2108 = vmatprep.subr.bf16.mxu1 %v2342_v3 }
 0x31f   :  { %2082 = vmatpush1.bf16.msra.mxu0 %v2467_v35  ;;  %2110 = vmatpush3.bf16.msra.mxu1 %v2513_v50 }
 0x320   :  { %2084 = vmatprep.subr.bf16.mxu0 %v2470_v36  ;;  %2111 = vmatprep.subr.bf16.mxu1 %v2342_v3 }
 0x323   :  { %2086 = vmatpush1.bf16.msra.mxu0 %v2495_v44  ;;  %2113 = vmatpush3.bf16.msra.mxu1 %v2541_v59 }
 0x324   :  { %2088 = vmatprep.subr.bf16.mxu0 %v2498_v45  ;;  %2114 = vmatprep.subr.bf16.mxu1 %v2342_v3 }
 0x327   :  { %2090 = vmatpush1.bf16.msra.mxu0 %v2523_v53  ;;  %2116 = vmatpush3.bf16.msra.mxu1 %v2563_v2 }
 0x328   :  { %2092 = vmatprep.subr.bf16.mxu0 %v2526_v54  ;;  %2117 = vmatprep.subr.bf16.mxu1 %v2342_v3 }
 0x32b   :  { %2094 = vmatpush1.bf16.msra.mxu0 %v2551_v62  ;;  %2119 = vmatpush3.bf16.msra.mxu1 %v2577_v11 }
 0x32c   :  { %2096 = vmatprep.subr.bf16.mxu0 %v2554_v63  ;;  %2120 = vmatprep.subr.bf16.mxu1 %v2342_v3 }
 0x32f   :  { %2098 = vmatpush1.bf16.msra.mxu0 %v2573_v8  ;;  %2122 = vmatpush3.bf16.msra.mxu1 %v2589_v14 }
 0x330   :  { %2124 = vmatprep.subr.bf16.mxu0 %v2376_v5  ;;  %2155 = vmatprep.subr.bf16.mxu1 %v2342_v3 }
 0x3e5   :  { %v638_v19 = vpop.f32.mrb[6].mxu0  ;;  %v709_v20 = vpop.f32.mrb[6].mxu1 }
 0x3e6   :  { %v713_v21 = vadd.f32 %v1407_v18, %v638_v19  ;;  %v640_v25 = vpop.f32.mrb[7].mxu0  ;;  %v1702_v27 = vpop.f32.mrb[7].mxu1  ;;  %v723_v38 = vadd.f32 %v2640_v30, %v709_v20  ;;  %v1413_v20 = vld [vmem:[%s2979_s0 + $0x70] sm:$0xff] }
 0x3e7   :  { %v718_v29 = vadd.f32 %v1408_v22, %v640_v25 }
 0x3e8   :  { %v714_v28 = vmul.f32 0.5, %v713_v21 }
 0x3e9   :  { %v719_v31 = vmul.f32 0.5, %v718_v29 }
 0x3ea   :  { %2312 = vtanh.f32 %v714_v28 }
 0x3eb   :  { %2314 = vtanh.f32 %v719_v31 }
 0x3f4   :  { %v2313_v33 = vpop.eup %2312 }
 0x3f5   :  { %v716_v34 = vadd.f32 1.0, %v2313_v33  ;;  %v2315_v42 = vpop.eup %2314 }
 0x3f6   :  { %v721_v46 = vadd.f32 1.0, %v2315_v42 }
 0x3f7   :  { %v717_v37 = vmul.f32 0.5, %v716_v34 }
 0x3f8   :  { %v722_v47 = vmul.f32 0.5, %v721_v46 }
 0x3f9   :  { %v724_v40 = vmul.f32 %v723_v38, %v717_v37  ;;  %v1415_v38 = vld [vmem:[%s2979_s0 + $0x78] sm:$0xff] }
 0x3fa   :  { %v727_v48 = vsub.f32 1.0, %v722_v47  ;;  %v729_v52 = vmul.f32 %v722_v47, %v2754_v17 }
 0x3fb   :  { %v725_v43 = vadd.f32 %v1409_v39, %v724_v40 }
 0x3fd   :  { %2316 = vtanh.f32 %v725_v43  ;;  %v1416_v43 = vld [vmem:[%s2979_s0 + $0x80] sm:$0xff] }
 0x407   :  { %v2317_v49 = vpop.eup %2316 }
 0x408   :  { %v728_v51 = vmul.f32 %v2317_v49, %v727_v48 }
 0x40a   :  { %v2808_v55 = vadd.f32 %v729_v52, %v728_v51 }
 0x40c   :  { %1410 = vst [vmem:[%s2981_s3 + $0x18] sm:$0xff] %v2808_v55  ;;  %802 = vmatmul.mubr.f32.vlgmr.msra.gmra.mrb[8].mxu0 %v2808_v55  ;;  %1736 = vmatmul.mubr.f32.vlgmr.msra.gmra.mrb[8].mxu1 %v2808_v55 }
 0x40d   :  { %2126 = vmatpush1.bf16.msra.mxu0 %v2389_v9  ;;  %2157 = vmatpush3.bf16.msra.mxu1 %v2433_v24 }
 0x40e   :  { %2128 = vmatprep.subr.bf16.mxu0 %v2391_v10  ;;  %2158 = vmatprep.subr.bf16.mxu1 %v2342_v3 }
 0x40f   :  { %966 = vmatprep.mubr.f32.mxu0 %v2343_v4  ;;  %1770 = vmatprep.mubr.msk.f32.mxu1 %vm2344_vm0, %v2343_v4 }
 0x411   :  { %2130 = vmatpush1.bf16.msra.mxu0 %v2407_v15  ;;  %2160 = vmatpush3.bf16.msra.mxu1 %v2457_v32 }
 0x412   :  { %2132 = vmatprep.subr.bf16.mxu0 %v2410_v16  ;;  %2161 = vmatprep.subr.bf16.mxu1 %v2342_v3 }
 0x415   :  { %2134 = vmatpush1.bf16.msra.mxu0 %v2431_v23  ;;  %2163 = vmatpush3.bf16.msra.mxu1 %v2485_v41 }
 0x416   :  { %2136 = vmatprep.subr.bf16.mxu0 %v2439_v26  ;;  %2164 = vmatprep.subr.bf16.mxu1 %v2342_v3 }
 0x419   :  { %2138 = vmatpush1.bf16.msra.mxu0 %v2467_v35  ;;  %2166 = vmatpush3.bf16.msra.mxu1 %v2513_v50 }
 0x41a   :  { %2140 = vmatprep.subr.bf16.mxu0 %v2470_v36  ;;  %2167 = vmatprep.subr.bf16.mxu1 %v2342_v3 }
 0x41d   :  { %2142 = vmatpush1.bf16.msra.mxu0 %v2495_v44  ;;  %2169 = vmatpush3.bf16.msra.mxu1 %v2541_v59 }
 0x41e   :  { %2144 = vmatprep.subr.bf16.mxu0 %v2498_v45  ;;  %2170 = vmatprep.subr.bf16.mxu1 %v2342_v3 }
 0x421   :  { %2146 = vmatpush1.bf16.msra.mxu0 %v2523_v53  ;;  %2172 = vmatpush3.bf16.msra.mxu1 %v2563_v2 }
 0x422   :  { %2148 = vmatprep.subr.bf16.mxu0 %v2526_v54  ;;  %2173 = vmatprep.subr.bf16.mxu1 %v2342_v3 }
 0x425   :  { %2150 = vmatpush1.bf16.msra.mxu0 %v2551_v62  ;;  %2175 = vmatpush3.bf16.msra.mxu1 %v2577_v11 }
 0x426   :  { %2152 = vmatprep.subr.bf16.mxu0 %v2554_v63  ;;  %2176 = vmatprep.subr.bf16.mxu1 %v2342_v3 }
 0x429   :  { %2154 = vmatpush1.bf16.msra.mxu0 %v2573_v8  ;;  %2178 = vmatpush3.bf16.msra.mxu1 %v2589_v14 }
 0x42a   :  { %2180 = vmatprep.subr.bf16.mxu0 %v2376_v5  ;;  %2211 = vmatprep.subr.bf16.mxu1 %v2342_v3 }
 0x4df   :  { %v803_v57 = vpop.f32.mrb[8].mxu0  ;;  %v874_v58 = vpop.f32.mrb[8].mxu1 }
 0x4e0   :  { %v878_v60 = vadd.f32 %v1411_v56, %v803_v57  ;;  %v805_v0 = vpop.f32.mrb[9].mxu0  ;;  %v1737_v1 = vpop.f32.mrb[9].mxu1  ;;  %v888_v19 = vadd.f32 %v2640_v30, %v874_v58  ;;  %v1417_v57 = vld [vmem:[%s2979_s0 + $0x88] sm:$0xff] }
 0x4e1   :  { %v883_v7 = vadd.f32 %v1412_v61, %v805_v0 }
 0x4e2   :  { %v879_v6 = vmul.f32 0.5, %v878_v60 }
 0x4e3   :  { %v884_v12 = vmul.f32 0.5, %v883_v7 }
 0x4e4   :  { %2318 = vtanh.f32 %v879_v6 }
 0x4e5   :  { %2320 = vtanh.f32 %v884_v12 }
 0x4ee   :  { %v2319_v13 = vpop.eup %2318 }
 0x4ef   :  { %v881_v17 = vadd.f32 1.0, %v2319_v13  ;;  %v2321_v22 = vpop.eup %2320 }
 0x4f0   :  { %v886_v27 = vadd.f32 1.0, %v2321_v22  ;;  %v1424_v22 = vld [vmem:[%s2979_s0 + $0xb0] sm:$0xff] }
 0x4f1   :  { %v882_v18 = vmul.f32 0.5, %v881_v17 }
 0x4f2   :  { %v887_v28 = vmul.f32 0.5, %v886_v27 }
 0x4f3   :  { %v889_v21 = vmul.f32 %v888_v19, %v882_v18  ;;  %v1423_v18 = vld [vmem:[%s2979_s0 + $0xa8] sm:$0xff] }
 0x4f4   :  { %v892_v29 = vsub.f32 1.0, %v887_v28  ;;  %v894_v34 = vmul.f32 %v887_v28, %v2808_v55 }
 0x4f5   :  { %v890_v25 = vadd.f32 %v1413_v20, %v889_v21 }
 0x4f7   :  { %2322 = vtanh.f32 %v890_v25 }
 0x501   :  { %v2323_v31 = vpop.eup %2322 }
 0x502   :  { %v893_v33 = vmul.f32 %v2323_v31, %v892_v29 }
 0x504   :  { %v2862_v37 = vadd.f32 %v894_v34, %v893_v33 }
 0x506   :  { %1414 = vst [vmem:[%s2981_s3 + $0x20] sm:$0xff] %v2862_v37  ;;  %967 = vmatmul.mubr.f32.vlgmr.msra.gmra.mrb[10].mxu0 %v2862_v37  ;;  %1771 = vmatmul.mubr.f32.vlgmr.msra.gmra.mrb[10].mxu1 %v2862_v37 }
 0x507   :  { %2182 = vmatpush1.bf16.msra.mxu0 %v2389_v9  ;;  %2213 = vmatpush3.bf16.msra.mxu1 %v2433_v24 }
 0x508   :  { %2184 = vmatprep.subr.bf16.mxu0 %v2391_v10  ;;  %2214 = vmatprep.subr.bf16.mxu1 %v2342_v3 }
 0x509   :  { %1131 = vmatprep.mubr.f32.mxu0 %v2343_v4  ;;  %1805 = vmatprep.mubr.msk.f32.mxu1 %vm2344_vm0, %v2343_v4 }
 0x50b   :  { %2186 = vmatpush1.bf16.msra.mxu0 %v2407_v15  ;;  %2216 = vmatpush3.bf16.msra.mxu1 %v2457_v32 }
 0x50c   :  { %2188 = vmatprep.subr.bf16.mxu0 %v2410_v16  ;;  %2217 = vmatprep.subr.bf16.mxu1 %v2342_v3 }
 0x50f   :  { %2190 = vmatpush1.bf16.msra.mxu0 %v2431_v23  ;;  %2219 = vmatpush3.bf16.msra.mxu1 %v2485_v41 }
 0x510   :  { %2192 = vmatprep.subr.bf16.mxu0 %v2439_v26  ;;  %2220 = vmatprep.subr.bf16.mxu1 %v2342_v3 }
 0x513   :  { %2194 = vmatpush1.bf16.msra.mxu0 %v2467_v35  ;;  %2222 = vmatpush3.bf16.msra.mxu1 %v2513_v50 }
 0x514   :  { %2196 = vmatprep.subr.bf16.mxu0 %v2470_v36  ;;  %2223 = vmatprep.subr.bf16.mxu1 %v2342_v3 }
 0x517   :  { %2198 = vmatpush1.bf16.msra.mxu0 %v2495_v44  ;;  %2225 = vmatpush3.bf16.msra.mxu1 %v2541_v59 }
 0x518   :  { %2200 = vmatprep.subr.bf16.mxu0 %v2498_v45  ;;  %2226 = vmatprep.subr.bf16.mxu1 %v2342_v3 }
 0x51b   :  { %2202 = vmatpush1.bf16.msra.mxu0 %v2523_v53  ;;  %2228 = vmatpush3.bf16.msra.mxu1 %v2563_v2 }
 0x51c   :  { %2204 = vmatprep.subr.bf16.mxu0 %v2526_v54  ;;  %2229 = vmatprep.subr.bf16.mxu1 %v2342_v3 }
 0x51f   :  { %2206 = vmatpush1.bf16.msra.mxu0 %v2551_v62  ;;  %2231 = vmatpush3.bf16.msra.mxu1 %v2577_v11 }
 0x520   :  { %2208 = vmatprep.subr.bf16.mxu0 %v2554_v63  ;;  %2232 = vmatprep.subr.bf16.mxu1 %v2342_v3 }
 0x523   :  { %2210 = vmatpush1.bf16.msra.mxu0 %v2573_v8  ;;  %2234 = vmatpush3.bf16.msra.mxu1 %v2589_v14 }
 0x524   :  { %2236 = vmatprep.subr.bf16.mxu0 %v2376_v5  ;;  %2267 = vmatprep.subr.bf16.mxu1 %v2342_v3 }
 0x5d9   :  { %v968_v39 = vpop.f32.mrb[10].mxu0  ;;  %v1039_v40 = vpop.f32.mrb[10].mxu1 }
 0x5da   :  { %v1043_v42 = vadd.f32 %v1415_v38, %v968_v39  ;;  %v970_v46 = vpop.f32.mrb[11].mxu0  ;;  %v1772_v47 = vpop.f32.mrb[11].mxu1  ;;  %v1053_v56 = vadd.f32 %v2640_v30, %v1039_v40  ;;  %v1425_v39 = vld [vmem:[%s2979_s0 + $0xb8] sm:$0xff] }
 0x5db   :  { %v1048_v49 = vadd.f32 %v1416_v43, %v970_v46 }
 0x5dc   :  { %v1044_v48 = vmul.f32 0.5, %v1043_v42 }
 0x5dd   :  { %v1049_v51 = vmul.f32 0.5, %v1048_v49 }
 0x5de   :  { %2324 = vtanh.f32 %v1044_v48 }
 0x5df   :  { %2326 = vtanh.f32 %v1049_v51 }
 0x5e8   :  { %v2325_v5 = vpop.eup %2324 }
 0x5e9   :  { %v1046_v52 = vadd.f32 1.0, %v2325_v5  ;;  %v2327_v60 = vpop.eup %2326 }
 0x5ea   :  { %v1051_v0 = vadd.f32 1.0, %v2327_v60 }
 0x5eb   :  { %v1047_v55 = vmul.f32 0.5, %v1046_v52 }
 0x5ec   :  { %v1052_v1 = vmul.f32 0.5, %v1051_v0 }
 0x5ed   :  { %v1054_v58 = vmul.f32 %v1053_v56, %v1047_v55 }
 0x5ee   :  { %v1057_v6 = vsub.f32 1.0, %v1052_v1  ;;  %v1059_v13 = vmul.f32 %v1052_v1, %v2862_v37 }
 0x5ef   :  { %v1055_v61 = vadd.f32 %v1417_v57, %v1054_v58 }
 0x5f1   :  { %2328 = vtanh.f32 %v1055_v61 }
 0x5fb   :  { %v2329_v7 = vpop.eup %2328 }
 0x5fc   :  { %v1058_v12 = vmul.f32 %v2329_v7, %v1057_v6 }
 0x5fe   :  { %v1060_v17 = vadd.f32 %v1059_v13, %v1058_v12 }
 0x600   :  { %1418 = vst [vmem:[%s2981_s3 + $0x28] sm:$0xff] %v1060_v17  ;;  %1132 = vmatmul.mubr.f32.vlgmr.msra.gmra.mrb[12].mxu0 %v1060_v17  ;;  %1806 = vmatmul.mubr.f32.vlgmr.msra.gmra.mrb[12].mxu1 %v1060_v17 }
 0x601   :  { %2238 = vmatpush1.bf16.msra.mxu0 %v2389_v9  ;;  %2269 = vmatpush3.bf16.msra.mxu1 %v2433_v24 }
 0x602   :  { %2240 = vmatprep.subr.bf16.mxu0 %v2391_v10  ;;  %2270 = vmatprep.subr.bf16.mxu1 %v2342_v3 }
 0x603   :  { %1296 = vmatprep.mubr.f32.mxu0 %v2343_v4  ;;  %1840 = vmatprep.mubr.msk.f32.mxu1 %vm2344_vm0, %v2343_v4  ;;  %v1419_v4 = vld [vmem:[%s2979_s0 + $0x90] sm:$0xff] }
 0x605   :  { %2242 = vmatpush1.bf16.msra.mxu0 %v2407_v15  ;;  %2272 = vmatpush3.bf16.msra.mxu1 %v2457_v32 }
 0x606   :  { %2244 = vmatprep.subr.bf16.mxu0 %v2410_v16  ;;  %2273 = vmatprep.subr.bf16.mxu1 %v2342_v3  ;;  %v1420_v16 = vld [vmem:[%s2979_s0 + $0x98] sm:$0xff] }
 0x609   :  { %2246 = vmatpush1.bf16.msra.mxu0 %v2431_v23  ;;  %2275 = vmatpush3.bf16.msra.mxu1 %v2485_v41 }
 0x60a   :  { %2248 = vmatprep.subr.bf16.mxu0 %v2439_v26  ;;  %2276 = vmatprep.subr.bf16.mxu1 %v2342_v3 }
 0x60d   :  { %2250 = vmatpush1.bf16.msra.mxu0 %v2467_v35  ;;  %2278 = vmatpush3.bf16.msra.mxu1 %v2513_v50 }
 0x60e   :  { %2252 = vmatprep.subr.bf16.mxu0 %v2470_v36  ;;  %2279 = vmatprep.subr.bf16.mxu1 %v2342_v3 }
 0x611   :  { %2254 = vmatpush1.bf16.msra.mxu0 %v2495_v44  ;;  %2281 = vmatpush3.bf16.msra.mxu1 %v2541_v59 }
 0x612   :  { %2256 = vmatprep.subr.bf16.mxu0 %v2498_v45  ;;  %2282 = vmatprep.subr.bf16.mxu1 %v2342_v3  ;;  %v1421_v45 = vld [vmem:[%s2979_s0 + $0xa0] sm:$0xff] }
 0x615   :  { %2258 = vmatpush1.bf16.msra.mxu0 %v2523_v53  ;;  %2284 = vmatpush3.bf16.msra.mxu1 %v2563_v2 }
 0x616   :  { %2260 = vmatprep.subr.bf16.mxu0 %v2526_v54  ;;  %2285 = vmatprep.subr.bf16.mxu1 %v2342_v3 }
 0x619   :  { %2262 = vmatpush1.bf16.msra.mxu0 %v2551_v62  ;;  %2287 = vmatpush3.bf16.msra.mxu1 %v2577_v11 }
 0x61a   :  { %2264 = vmatprep.subr.bf16.mxu0 %v2554_v63  ;;  %2288 = vmatprep.subr.bf16.mxu1 %v2342_v3 }
 0x61d   :  { %2266 = vmatpush1.bf16.msra.mxu0 %v2573_v8  ;;  %2290 = vmatpush3.bf16.msra.mxu1 %v2589_v14 }
 0x6d3   :  { %v1133_v9 = vpop.f32.mrb[12].mxu0  ;;  %v1204_v10 = vpop.f32.mrb[12].mxu1 }
 0x6d4   :  { %v1208_v15 = vadd.f32 %v1419_v4, %v1133_v9  ;;  %v1135_v23 = vpop.f32.mrb[13].mxu0  ;;  %v1807_v24 = vpop.f32.mrb[13].mxu1  ;;  %v1218_v44 = vadd.f32 %v2640_v30, %v1204_v10 }
 0x6d5   :  { %v1213_v32 = vadd.f32 %v1420_v16, %v1135_v23 }
 0x6d6   :  { %v1209_v26 = vmul.f32 0.5, %v1208_v15 }
 0x6d7   :  { %v1214_v3 = vmul.f32 0.5, %v1213_v32 }
 0x6d8   :  { %2330 = vtanh.f32 %v1209_v26 }
 0x6d9   :  { %2332 = vtanh.f32 %v1214_v3 }
 0x6e2   :  { %v2331_v35 = vpop.eup %2330 }
 0x6e3   :  { %v1211_v36 = vadd.f32 1.0, %v2331_v35  ;;  %v2333_v53 = vpop.eup %2332 }
 0x6e4   :  { %v1216_v59 = vadd.f32 1.0, %v2333_v53 }
 0x6e5   :  { %v1212_v41 = vmul.f32 0.5, %v1211_v36 }
 0x6e6   :  { %v1217_v62 = vmul.f32 0.5, %v1216_v59 }
 0x6e7   :  { %v1219_v50 = vmul.f32 %v1218_v44, %v1212_v41 }
 0x6e8   :  { %v1222_v63 = vsub.f32 1.0, %v1217_v62  ;;  %v1224_v11 = vmul.f32 %v1217_v62, %v1060_v17 }
 0x6e9   :  { %v1220_v54 = vadd.f32 %v1421_v45, %v1219_v50 }
 0x6eb   :  { %2334 = vtanh.f32 %v1220_v54 }
 0x6f5   :  { %v2335_v2 = vpop.eup %2334 }
 0x6f6   :  { %v1223_v8 = vmul.f32 %v2335_v2, %v1222_v63 }
 0x6f8   :  { %v1225_v14 = vadd.f32 %v1224_v11, %v1223_v8 }
 0x6fa   :  { %1422 = vst [vmem:[%s2981_s3 + $0x30] sm:$0xff] %v1225_v14  ;;  %1297 = vmatmul.mubr.f32.vlgmr.msra.gmra.mrb[14].mxu0 %v1225_v14  ;;  %1841 = vmatmul.mubr.f32.vlgmr.msra.gmra.mrb[14].mxu1 %v1225_v14 }
 0x7cd   :  { %v1298_v19 = vpop.f32.mrb[14].mxu0  ;;  %v1369_v20 = vpop.f32.mrb[14].mxu1 }
 0x7ce   :  { %v1373_v21 = vadd.f32 %v1423_v18, %v1298_v19  ;;  %v1300_v25 = vpop.f32.mrb[15].mxu0  ;;  %v1842_v27 = vpop.f32.mrb[15].mxu1  ;;  %v1383_v38 = vadd.f32 %v2640_v30, %v1369_v20 }
 0x7cf   :  { %v1378_v29 = vadd.f32 %v1424_v22, %v1300_v25 }
 0x7d0   :  { %v1374_v28 = vmul.f32 0.5, %v1373_v21 }
 0x7d1   :  { %v1379_v31 = vmul.f32 0.5, %v1378_v29 }
 0x7d2   :  { %2336 = vtanh.f32 %v1374_v28 }
 0x7d3   :  { %2338 = vtanh.f32 %v1379_v31 }
 0x7dc   :  { %v2337_v33 = vpop.eup %2336 }
 0x7dd   :  { %v1376_v34 = vadd.f32 1.0, %v2337_v33  ;;  %v2339_v42 = vpop.eup %2338 }
 0x7de   :  { %v1381_v46 = vadd.f32 1.0, %v2339_v42 }
 0x7df   :  { %v1377_v37 = vmul.f32 0.5, %v1376_v34 }
 0x7e0   :  { %v1382_v47 = vmul.f32 0.5, %v1381_v46 }
 0x7e1   :  { %v1384_v40 = vmul.f32 %v1383_v38, %v1377_v37 }
 0x7e2   :  { %v1387_v48 = vsub.f32 1.0, %v1382_v47  ;;  %v1389_v5 = vmul.f32 %v1382_v47, %v1225_v14 }
 0x7e3   :  { %v1385_v43 = vadd.f32 %v1425_v39, %v1384_v40 }
 0x7e5   :  { %2340 = vtanh.f32 %v1385_v43 }
 0x7ef   :  { %v2341_v49 = vpop.eup %2340 }
 0x7f0   :  { %v1388_v51 = vmul.f32 %v2341_v49, %v1387_v48 }
 0x7f2   :  { %v1390_v52 = vadd.f32 %v1389_v5, %v1388_v51 }
 0x7f4   :  { %1426 = vst [vmem:[%s2981_s3 + $0x38] sm:$0xff] %v1390_v52 }

</bundles_post_ra>
